<compile_context>
chip_gen: v5e
topology: v5e:2x2
jax: 0.10.0
libtpu: 0.0.40
codegen_flags: <defaults>
</compile_context>

<pallas_src>
import jax
import jax.numpy as jnp
from jax import lax
from jax.experimental import pallas as pl
from jax.experimental.pallas import tpu as pltpu


# ---------------------------------------------------------------------------
# Pallas kernel: one bidirectional GRU layer (both directions), chunked in time.
# ---------------------------------------------------------------------------
def _bigru_kernel(gi_ref, whh_ref, bhn_ref, out_ref, hf_ref, h_sc):
    """grid = (direction, time-chunk).  direction is "parallel", time is "arbitrary".

    gi_ref  : (T_CHUNK, 3, B, H) bf16  hoisted x@W_ih + folded biases (gate-major)
    whh_ref : (3, H, H)          bf16  recurrent weights, gate-major
    bhn_ref : (1, H)             f32   b_hn (only bias still needed inside the loop)
    out_ref : (T_CHUNK, B, H)    f32   per-timestep hidden states
    hf_ref  : (B, H)             f32   final hidden state for this direction (resident)
    h_sc    : (B, H)             f32   hidden state carried across time chunks
    """
    d = pl.program_id(0)          # 0 = forward, 1 = backward
    tb = pl.program_id(1)

    @pl.when(tb == 0)
    def _():
        h_sc[...] = jnp.zeros_like(h_sc)          # PyTorch default h0 = 0

    t_chunk = gi_ref.shape[0]
    w_r = whh_ref[0]                              # (H, H) bf16
    w_z = whh_ref[1]
    w_n = whh_ref[2]
    b_hn = bhn_ref[...]                           # (1, H) f32

    def step(s, h):
        # forward walks the chunk 0..t_chunk-1; backward walks it in reverse
        t = d * (t_chunk - 1 - 2 * s) + s
        gi = gi_ref[t].astype(jnp.float32)        # (3, B, H): [r, z, n] pre-activations
        hb = h.astype(w_r.dtype)
        gh_r = jnp.dot(hb, w_r, preferred_element_type=jnp.float32)
        gh_z = jnp.dot(hb, w_z, preferred_element_type=jnp.float32)
        gh_n = jnp.dot(hb, w_n, preferred_element_type=jnp.float32)
        r = jax.nn.sigmoid(gi[0] + gh_r)
        z = jax.nn.sigmoid(gi[1] + gh_z)
        n = jnp.tanh(gi[2] + r * (gh_n + b_hn))
        h_new = (1.0 - z) * n + z * h
        out_ref[t] = h_new.astype(out_ref.dtype)
        return h_new

    h_last = lax.fori_loop(0, t_chunk, step, h_sc[...], unroll=True)
    h_sc[...] = h_last

    @pl.when(tb == pl.num_programs(1) - 1)
    def _():
        hf_ref[...] = h_last.astype(hf_ref.dtype)


def _pick_time_chunk(T, target=32):
    """Largest divisor of T not exceeding `target` (keeps unrolled body bounded)."""
    # TODO(synk): for very long / prime T, pad time instead of shrinking the chunk.
    c = min(T, target)
    while T % c != 0:
        c -= 1
    return c


def bigru_layer(gi, w_hh, b_hn, t_chunk=None):
    """Run one bidirectional GRU layer over the whole sequence.

    gi   : (2, T, 3, B, H) bf16  hoisted input projection (bias-folded), gate-major
    w_hh : (2, 3, H, H)    bf16  recurrent weights, gate-major
    b_hn : (2, 1, H)       f32   n-gate recurrent bias
    returns: outputs (2, T, B, H) f32  [dir 0 = forward, dir 1 = backward, time-major],
             final hidden (2, B, H) f32
    """
    _, T, _, B, H = gi.shape
    if t_chunk is None:
        t_chunk = _pick_time_chunk(T)
    n_tb = T // t_chunk

    def tmap(d, tb):
        # forward: chunk tb ; backward: chunk n_tb-1-tb  (reversal via index_map,
        # so no materialized x[::-1] / out[::-1] HBM passes)
        return d * (n_tb - 1) + (1 - 2 * d) * tb

    out, hf = pl.pallas_call(
        _bigru_kernel,
        out_shape=(jax.ShapeDtypeStruct((2, T, B, H), jnp.float32),
                   jax.ShapeDtypeStruct((2, B, H), jnp.float32)),
        grid=(2, n_tb),
        in_specs=[
            pl.BlockSpec((None, t_chunk, 3, B, H),
                         lambda d, tb: (d, tmap(d, tb), 0, 0, 0)),     # Gi
            pl.BlockSpec((None, 3, H, H), lambda d, tb: (d, 0, 0, 0)),  # W_hh (constant in time)
            pl.BlockSpec((None, 1, H), lambda d, tb: (d, 0, 0)),        # b_hn
        ],
        out_specs=(
            pl.BlockSpec((None, t_chunk, B, H),
                         lambda d, tb: (d, tmap(d, tb), 0, 0)),         # per-step outputs
            pl.BlockSpec((None, B, H), lambda d, tb: (d, 0, 0)),        # final hidden (resident)
        ),
        scratch_shapes=[pltpu.VMEM((B, H), jnp.float32)],               # carried hidden state
        compiler_params=pltpu.CompilerParams(
            dimension_semantics=("parallel", "arbitrary"),
            vmem_limit_bytes=32 * 1024 * 1024),
    )(gi, w_hh, b_hn)
    return out, hf


# ---------------------------------------------------------------------------
# Hoisted (non-recurrent) input projection: one big batched matmul in XLA.
# ---------------------------------------------------------------------------
def _input_projection(parts, w_ih, b_fold):
    """parts : list of (T, B, Dk) arrays whose feature-concat is the layer input
       w_ih  : (2, D_in, 3, H) bf16, D_in = sum(Dk)     (gate-major, pre-transposed)
       b_fold: (2, 3, H) f32   (= b_ih, with b_hh folded in for the r/z gates)
       returns Gi : (2, T, 3, B, H) bf16
    """
    gi = None
    off = 0
    for p in parts:
        dk = p.shape[-1]
        w = w_ih[:, off:off + dk]                      # (2, Dk, 3, H)
        term = jnp.einsum("tbx,dxgh->dtgbh", p.astype(jnp.bfloat16), w,
                          preferred_element_type=jnp.float32)
        gi = term if gi is None else gi + term
        off += dk
    gi = gi + b_fold[:, None, :, None, :]
    return gi.astype(jnp.bfloat16)


# ---------------------------------------------------------------------------
# Parameter construction (deterministic, PyTorch-equivalent distributions)
# ---------------------------------------------------------------------------
def init_encoder_params(key, en_vocab_size, emb_dim, hid_dim, n_layers):
    bound = 1.0 / (hid_dim ** 0.5)
    key, k_emb = jax.random.split(key)
    params = {"embedding": jax.random.normal(k_emb, (en_vocab_size, emb_dim),
                                             jnp.float32)}   # nn.Embedding ~ N(0,1)
    gate_mask = jnp.array([1.0, 1.0, 0.0], jnp.float32).reshape(1, 3, 1)
    layers = []
    for l in range(n_layers):
        d_in = emb_dim if l == 0 else 2 * hid_dim
        key, k1, k2, k3, k4 = jax.random.split(key, 5)
        w_ih = jax.random.uniform(k1, (2, d_in, 3, hid_dim), jnp.float32, -bound, bound)
        w_hh = jax.random.uniform(k2, (2, 3, hid_dim, hid_dim), jnp.float32, -bound, bound)
        b_ih = jax.random.uniform(k3, (2, 3, hid_dim), jnp.float32, -bound, bound)
        b_hh = jax.random.uniform(k4, (2, 3, hid_dim), jnp.float32, -bound, bound)
        layers.append({
            "w_ih": w_ih.astype(jnp.bfloat16),        # (2, D_in, 3, H) gate-major
            "w_hh": w_hh.astype(jnp.bfloat16),        # (2, 3, H, H)    gate-major
            "b_fold": b_ih + b_hh * gate_mask,        # (2, 3, H) f32, r/z biases folded
            "b_hn": b_hh[:, 2][:, None, :],           # (2, 1, H) f32, kept in-loop
            "b_ih": b_ih, "b_hh": b_hh,               # raw copies (reference check only)
        })
    params["layers"] = layers
    return params


# ---------------------------------------------------------------------------
# Encoder forward (matches torch Encoder.forward in eval mode)
# ---------------------------------------------------------------------------
def encoder_forward(params, tokens):
    """tokens: (B, T) int32 -> (outputs (B, T, 2H), hidden (2*n_layers, B, H))"""
    B, T = tokens.shape
    H = params["layers"][0]["w_hh"].shape[-1]

    emb = jnp.take(params["embedding"], tokens, axis=0)         # (B, T, E)
    # TODO(synk): nn.Dropout / inter-layer GRU dropout are identity in eval mode;
    #             training-mode RNG dropout masks are not implemented.
    x_parts = [jnp.transpose(emb, (1, 0, 2)).astype(jnp.float32)]   # time-major (T, B, E)

    hiddens = []
    out = None
    for layer in params["layers"]:
        gi = _input_projection(x_parts, layer["w_ih"], layer["b_fold"])
        out, hf = bigru_layer(gi, layer["w_hh"], layer["b_hn"])
        x_parts = [out[0], out[1]]      # fwd / bwd halves feed the next layer (no concat)
        hiddens.append(hf)              # (2, B, H): [fwd, bwd]

    outputs = jnp.transpose(out, (2, 1, 0, 3)).reshape(B, T, 2 * H)   # batch_first concat
    hidden = jnp.concatenate(hiddens, axis=0)                         # (2*n_layers, B, H)
    return outputs, hidden


# ---------------------------------------------------------------------------
# Pure-JAX reference (straightforward f32 lax.scan GRU) for a coarse sanity check
# ---------------------------------------------------------------------------
def _reference_encoder(params, tokens):
    B, _ = tokens.shape
    emb = jnp.take(params["embedding"], tokens, axis=0)
    x = jnp.transpose(emb, (1, 0, 2)).astype(jnp.float32)
    hiddens = []
    for layer in params["layers"]:
        w_ih = layer["w_ih"].astype(jnp.float32)     # (2, D_in, 3, H)
        w_hh = layer["w_hh"].astype(jnp.float32)     # (2, 3, H, H)
        b_ih, b_hh = layer["b_ih"], layer["b_hh"]    # (2, 3, H)
        H = w_hh.shape[-1]
        outs = []
        for d in range(2):
            xs = x if d == 0 else x[::-1]

            def step(h, x_t, d=d):
                gi = jnp.einsum("bx,xgh->gbh", x_t, w_ih[d]) + b_ih[d][:, None, :]
                gh = jnp.einsum("bh,ghi->gbi", h, w_hh[d]) + b_hh[d][:, None, :]
                r = jax.nn.sigmoid(gi[0] + gh[0])
                z = jax.nn.sigmoid(gi[1] + gh[1])
                n = jnp.tanh(gi[2] + r * gh[2])
                h_new = (1.0 - z) * n + z * h
                return h_new, h_new

            hf, out = lax.scan(step, jnp.zeros((B, H), jnp.float32), xs)
            outs.append(out if d == 0 else out[::-1])
            hiddens.append(hf)
        x = jnp.concatenate(outs, axis=-1)
    return jnp.transpose(x, (1, 0, 2)), jnp.stack(hiddens, axis=0)


if __name__ == "__main__":
    # small shapes consistent with the module
    en_vocab_size, emb_dim, hid_dim, n_layers, dropout = 50, 16, 32, 2, 0.5
    B, T = 2, 8

    key = jax.random.PRNGKey(0)
    key, k_tok, k_par = jax.random.split(key, 3)
    tokens = jax.random.randint(k_tok, (B, T), 0, en_vocab_size, dtype=jnp.int32)
    params = init_encoder_params(k_par, en_vocab_size, emb_dim, hid_dim, n_layers)

    outputs, hidden = jax.jit(encoder_forward)(params, tokens)
    jax.block_until_ready((outputs, hidden))

    assert outputs.shape == (B, T, 2 * hid_dim), outputs.shape
    assert hidden.shape == (2 * n_layers, B, hid_dim), hidden.shape

    # coarse sanity check vs an f32 reference (kernel uses bf16 weights/activations)
    ref_out, ref_hid = _reference_encoder(params, tokens)
    err_o = float(jnp.max(jnp.abs(outputs - ref_out)))
    err_h = float(jnp.max(jnp.abs(hidden - ref_hid)))
    assert err_o < 1e-1 and err_h < 1e-1, (err_o, err_h)

    print("KERNEL_OK")
</pallas_src>

<mosaic_0001>
module attributes {stable_mosaic.version = 11 : i64} {
  func.func @_bigru_kernel(%arg0: i32, %arg1: i32, %arg2: memref<1x8x3x2x32xbf16, #tpu.memory_space<vmem>>, %arg3: memref<1x3x32x32xbf16, #tpu.memory_space<vmem>>, %arg4: memref<1x1x32xf32, #tpu.memory_space<vmem>>, %arg5: memref<1x8x2x32xf32, #tpu.memory_space<vmem>>, %arg6: memref<1x2x32xf32, #tpu.memory_space<vmem>>, %arg7: memref<2x32xf32, #tpu.memory_space<vmem>>) attributes {dimension_semantics = [#tpu.dimension_semantics<parallel>, #tpu.dimension_semantics<arbitrary>], iteration_bounds = array<i64: 2, 1>, scalar_prefetch = 0 : i64, scratch_operands = 1 : i64, tpu.core_type = #tpu.core_type<tc>, window_params = [{transform_indices = @transform_0, window_bounds = array<i64: 1, 8, 3, 2, 32>}, {transform_indices = @transform_1, window_bounds = array<i64: 1, 3, 32, 32>}, {transform_indices = @transform_2, window_bounds = array<i64: 1, 1, 32>}, {transform_indices = @transform_3, window_bounds = array<i64: 1, 8, 2, 32>}, {transform_indices = @transform_4, window_bounds = array<i64: 1, 2, 32>}]} {
    %c0_i32 = arith.constant 0 : i32
    %0 = arith.cmpi eq, %arg1, %c0_i32 : i32
    %1 = arith.extui %0 : i1 to i32
    %c0_i32_0 = arith.constant 0 : i32
    %2 = arith.cmpi ne, %1, %c0_i32_0 : i32
    scf.if %2 {
      %cst_139 = arith.constant 0.000000e+00 : f32
      %368 = vector.broadcast %cst_139 : f32 to vector<2x32xf32>
      %c0_140 = arith.constant 0 : index
      %c0_141 = arith.constant 0 : index
      %369 = vector.load %arg7[%c0_140, %c0_141] : memref<2x32xf32, #tpu.memory_space<vmem>>, vector<2x32xf32>
      tpu.vector_store %arg7[%c0_140, %c0_141], %368 {strides = array<i32>} : memref<2x32xf32, #tpu.memory_space<vmem>>, vector<2x32xf32>,
    } else {
    }
    %c0 = arith.constant 0 : index
    %c0_1 = arith.constant 0 : index
    %c0_2 = arith.constant 0 : index
    %c0_3 = arith.constant 0 : index
    %3 = vector.load %arg3[%c0, %c0_1, %c0_2, %c0_3] : memref<1x3x32x32xbf16, #tpu.memory_space<vmem>>, vector<1x1x32x32xbf16>
    %4 = vector.shape_cast %3 : vector<1x1x32x32xbf16> to vector<32x32xbf16>
    %c0_4 = arith.constant 0 : index
    %c1 = arith.constant 1 : index
    %c0_5 = arith.constant 0 : index
    %c0_6 = arith.constant 0 : index
    %5 = vector.load %arg3[%c0_4, %c1, %c0_5, %c0_6] : memref<1x3x32x32xbf16, #tpu.memory_space<vmem>>, vector<1x1x32x32xbf16>
    %6 = vector.shape_cast %5 : vector<1x1x32x32xbf16> to vector<32x32xbf16>
    %c0_7 = arith.constant 0 : index
    %c2 = arith.constant 2 : index
    %c0_8 = arith.constant 0 : index
    %c0_9 = arith.constant 0 : index
    %7 = vector.load %arg3[%c0_7, %c2, %c0_8, %c0_9] : memref<1x3x32x32xbf16, #tpu.memory_space<vmem>>, vector<1x1x32x32xbf16>
    %8 = vector.shape_cast %7 : vector<1x1x32x32xbf16> to vector<32x32xbf16>
    %c0_10 = arith.constant 0 : index
    %c0_11 = arith.constant 0 : index
    %c0_12 = arith.constant 0 : index
    %9 = vector.load %arg4[%c0_10, %c0_11, %c0_12] : memref<1x1x32xf32, #tpu.memory_space<vmem>>, vector<1x1x32xf32>
    %10 = vector.shape_cast %9 : vector<1x1x32xf32> to vector<1x32xf32>
    %c0_13 = arith.constant 0 : index
    %c0_14 = arith.constant 0 : index
    %11 = vector.load %arg7[%c0_13, %c0_14] : memref<2x32xf32, #tpu.memory_space<vmem>>, vector<2x32xf32>
    %c0_i32_15 = arith.constant 0 : i32
    %c2_i32 = arith.constant 2 : i32
    %12 = arith.muli %c2_i32, %c0_i32_15 : i32
    %c7_i32 = arith.constant 7 : i32
    %13 = arith.subi %c7_i32, %12 : i32
    %14 = arith.muli %arg0, %13 : i32
    %15 = arith.addi %14, %c0_i32_15 : i32
    %c0_16 = arith.constant 0 : index
    %16 = arith.index_cast %15 : i32 to index
    %c0_17 = arith.constant 0 : index
    %c0_18 = arith.constant 0 : index
    %c0_19 = arith.constant 0 : index
    %17 = vector.load %arg2[%c0_16, %16, %c0_17, %c0_18, %c0_19] : memref<1x8x3x2x32xbf16, #tpu.memory_space<vmem>>, vector<1x1x3x2x32xbf16>
    %18 = vector.shape_cast %17 : vector<1x1x3x2x32xbf16> to vector<3x2x32xbf16>
    %19 = arith.extf %18 : vector<3x2x32xbf16> to vector<3x2x32xf32>
    %20 = arith.truncf %11 : vector<2x32xf32> to vector<2x32xbf16>
    %cst = arith.constant dense<0.000000e+00> : vector<2x32xf32>
    %21 = tpu.matmul %20, %4, %cst {dimension_numbers = #tpu.dot_dimension_numbers<[1], [0], [0], [1], [0, 0, 1, 1], [], []>} : vector<2x32xbf16>, vector<32x32xbf16>, vector<2x32xf32> -> vector<2x32xf32>
    %cst_20 = arith.constant dense<0.000000e+00> : vector<2x32xf32>
    %22 = tpu.matmul %20, %6, %cst_20 {dimension_numbers = #tpu.dot_dimension_numbers<[1], [0], [0], [1], [0, 0, 1, 1], [], []>} : vector<2x32xbf16>, vector<32x32xbf16>, vector<2x32xf32> -> vector<2x32xf32>
    %cst_21 = arith.constant dense<0.000000e+00> : vector<2x32xf32>
    %23 = tpu.matmul %20, %8, %cst_21 {dimension_numbers = #tpu.dot_dimension_numbers<[1], [0], [0], [1], [0, 0, 1, 1], [], []>} : vector<2x32xbf16>, vector<32x32xbf16>, vector<2x32xf32> -> vector<2x32xf32>
    %24 = vector.extract_strided_slice %19 {offsets = [0, 0, 0], sizes = [1, 2, 32], strides = [1, 1, 1]} : vector<3x2x32xf32> to vector<1x2x32xf32>
    %25 = vector.shape_cast %24 : vector<1x2x32xf32> to vector<2x32xf32>
    %26 = arith.addf %25, %21 : vector<2x32xf32>
    %27 = arith.negf %26 : vector<2x32xf32>
    %28 = math.exp %27 : vector<2x32xf32>
    %cst_22 = arith.constant 1.000000e+00 : f32
    %29 = vector.broadcast %cst_22 : f32 to vector<2x32xf32>
    %30 = arith.addf %29, %28 : vector<2x32xf32>
    %31 = arith.divf %29, %30 : vector<2x32xf32>
    %32 = vector.extract_strided_slice %19 {offsets = [1, 0, 0], sizes = [1, 2, 32], strides = [1, 1, 1]} : vector<3x2x32xf32> to vector<1x2x32xf32>
    %33 = vector.shape_cast %32 : vector<1x2x32xf32> to vector<2x32xf32>
    %34 = arith.addf %33, %22 : vector<2x32xf32>
    %35 = arith.negf %34 : vector<2x32xf32>
    %36 = math.exp %35 : vector<2x32xf32>
    %cst_23 = arith.constant 1.000000e+00 : f32
    %37 = vector.broadcast %cst_23 : f32 to vector<2x32xf32>
    %38 = arith.addf %37, %36 : vector<2x32xf32>
    %39 = arith.divf %37, %38 : vector<2x32xf32>
    %40 = vector.extract_strided_slice %19 {offsets = [2, 0, 0], sizes = [1, 2, 32], strides = [1, 1, 1]} : vector<3x2x32xf32> to vector<1x2x32xf32>
    %41 = vector.shape_cast %40 : vector<1x2x32xf32> to vector<2x32xf32>
    %42 = vector.broadcast %10 : vector<1x32xf32> to vector<2x32xf32>
    %43 = arith.addf %23, %42 : vector<2x32xf32>
    %44 = arith.mulf %31, %43 : vector<2x32xf32>
    %45 = arith.addf %41, %44 : vector<2x32xf32>
    %46 = math.tanh %45 : vector<2x32xf32>
    %cst_24 = arith.constant 1.000000e+00 : f32
    %47 = vector.broadcast %cst_24 : f32 to vector<2x32xf32>
    %48 = arith.subf %47, %39 : vector<2x32xf32>
    %49 = arith.mulf %48, %46 : vector<2x32xf32>
    %50 = arith.mulf %39, %11 : vector<2x32xf32>
    %51 = arith.addf %49, %50 : vector<2x32xf32>
    %c0_25 = arith.constant 0 : index
    %52 = arith.index_cast %15 : i32 to index
    %c0_26 = arith.constant 0 : index
    %c0_27 = arith.constant 0 : index
    %53 = vector.load %arg5[%c0_25, %52, %c0_26, %c0_27] : memref<1x8x2x32xf32, #tpu.memory_space<vmem>>, vector<1x1x2x32xf32>
    %54 = vector.shape_cast %53 : vector<1x1x2x32xf32> to vector<2x32xf32>
    %55 = vector.shape_cast %51 : vector<2x32xf32> to vector<1x1x2x32xf32>
    tpu.vector_store %arg5[%c0_25, %52, %c0_26, %c0_27], %55 {strides = array<i32>} : memref<1x8x2x32xf32, #tpu.memory_space<vmem>>, vector<1x1x2x32xf32>,
    %c1_i32 = arith.constant 1 : i32
    %c2_i32_28 = arith.constant 2 : i32
    %56 = arith.muli %c2_i32_28, %c1_i32 : i32
    %c7_i32_29 = arith.constant 7 : i32
    %57 = arith.subi %c7_i32_29, %56 : i32
    %58 = arith.muli %arg0, %57 : i32
    %59 = arith.addi %58, %c1_i32 : i32
    %c0_30 = arith.constant 0 : index
    %60 = arith.index_cast %59 : i32 to index
    %c0_31 = arith.constant 0 : index
    %c0_32 = arith.constant 0 : index
    %c0_33 = arith.constant 0 : index
    %61 = vector.load %arg2[%c0_30, %60, %c0_31, %c0_32, %c0_33] : memref<1x8x3x2x32xbf16, #tpu.memory_space<vmem>>, vector<1x1x3x2x32xbf16>
    %62 = vector.shape_cast %61 : vector<1x1x3x2x32xbf16> to vector<3x2x32xbf16>
    %63 = arith.extf %62 : vector<3x2x32xbf16> to vector<3x2x32xf32>
    %64 = arith.truncf %51 : vector<2x32xf32> to vector<2x32xbf16>
    %cst_34 = arith.constant dense<0.000000e+00> : vector<2x32xf32>
    %65 = tpu.matmul %64, %4, %cst_34 {dimension_numbers = #tpu.dot_dimension_numbers<[1], [0], [0], [1], [0, 0, 1, 1], [], []>} : vector<2x32xbf16>, vector<32x32xbf16>, vector<2x32xf32> -> vector<2x32xf32>
    %cst_35 = arith.constant dense<0.000000e+00> : vector<2x32xf32>
    %66 = tpu.matmul %64, %6, %cst_35 {dimension_numbers = #tpu.dot_dimension_numbers<[1], [0], [0], [1], [0, 0, 1, 1], [], []>} : vector<2x32xbf16>, vector<32x32xbf16>, vector<2x32xf32> -> vector<2x32xf32>
    %cst_36 = arith.constant dense<0.000000e+00> : vector<2x32xf32>
    %67 = tpu.matmul %64, %8, %cst_36 {dimension_numbers = #tpu.dot_dimension_numbers<[1], [0], [0], [1], [0, 0, 1, 1], [], []>} : vector<2x32xbf16>, vector<32x32xbf16>, vector<2x32xf32> -> vector<2x32xf32>
    %68 = vector.extract_strided_slice %63 {offsets = [0, 0, 0], sizes = [1, 2, 32], strides = [1, 1, 1]} : vector<3x2x32xf32> to vector<1x2x32xf32>
    %69 = vector.shape_cast %68 : vector<1x2x32xf32> to vector<2x32xf32>
    %70 = arith.addf %69, %65 : vector<2x32xf32>
    %71 = arith.negf %70 : vector<2x32xf32>
    %72 = math.exp %71 : vector<2x32xf32>
    %cst_37 = arith.constant 1.000000e+00 : f32
    %73 = vector.broadcast %cst_37 : f32 to vector<2x32xf32>
    %74 = arith.addf %73, %72 : vector<2x32xf32>
    %75 = arith.divf %73, %74 : vector<2x32xf32>
    %76 = vector.extract_strided_slice %63 {offsets = [1, 0, 0], sizes = [1, 2, 32], strides = [1, 1, 1]} : vector<3x2x32xf32> to vector<1x2x32xf32>
    %77 = vector.shape_cast %76 : vector<1x2x32xf32> to vector<2x32xf32>
    %78 = arith.addf %77, %66 : vector<2x32xf32>
    %79 = arith.negf %78 : vector<2x32xf32>
    %80 = math.exp %79 : vector<2x32xf32>
    %cst_38 = arith.constant 1.000000e+00 : f32
    %81 = vector.broadcast %cst_38 : f32 to vector<2x32xf32>
    %82 = arith.addf %81, %80 : vector<2x32xf32>
    %83 = arith.divf %81, %82 : vector<2x32xf32>
    %84 = vector.extract_strided_slice %63 {offsets = [2, 0, 0], sizes = [1, 2, 32], strides = [1, 1, 1]} : vector<3x2x32xf32> to vector<1x2x32xf32>
    %85 = vector.shape_cast %84 : vector<1x2x32xf32> to vector<2x32xf32>
    %86 = vector.broadcast %10 : vector<1x32xf32> to vector<2x32xf32>
    %87 = arith.addf %67, %86 : vector<2x32xf32>
    %88 = arith.mulf %75, %87 : vector<2x32xf32>
    %89 = arith.addf %85, %88 : vector<2x32xf32>
    %90 = math.tanh %89 : vector<2x32xf32>
    %cst_39 = arith.constant 1.000000e+00 : f32
    %91 = vector.broadcast %cst_39 : f32 to vector<2x32xf32>
    %92 = arith.subf %91, %83 : vector<2x32xf32>
    %93 = arith.mulf %92, %90 : vector<2x32xf32>
    %94 = arith.mulf %83, %51 : vector<2x32xf32>
    %95 = arith.addf %93, %94 : vector<2x32xf32>
    %c0_40 = arith.constant 0 : index
    %96 = arith.index_cast %59 : i32 to index
    %c0_41 = arith.constant 0 : index
    %c0_42 = arith.constant 0 : index
    %97 = vector.load %arg5[%c0_40, %96, %c0_41, %c0_42] : memref<1x8x2x32xf32, #tpu.memory_space<vmem>>, vector<1x1x2x32xf32>
    %98 = vector.shape_cast %97 : vector<1x1x2x32xf32> to vector<2x32xf32>
    %99 = vector.shape_cast %95 : vector<2x32xf32> to vector<1x1x2x32xf32>
    tpu.vector_store %arg5[%c0_40, %96, %c0_41, %c0_42], %99 {strides = array<i32>} : memref<1x8x2x32xf32, #tpu.memory_space<vmem>>, vector<1x1x2x32xf32>,
    %c2_i32_43 = arith.constant 2 : i32
    %c2_i32_44 = arith.constant 2 : i32
    %100 = arith.muli %c2_i32_44, %c2_i32_43 : i32
    %c7_i32_45 = arith.constant 7 : i32
    %101 = arith.subi %c7_i32_45, %100 : i32
    %102 = arith.muli %arg0, %101 : i32
    %103 = arith.addi %102, %c2_i32_43 : i32
    %c0_46 = arith.constant 0 : index
    %104 = arith.index_cast %103 : i32 to index
    %c0_47 = arith.constant 0 : index
    %c0_48 = arith.constant 0 : index
    %c0_49 = arith.constant 0 : index
    %105 = vector.load %arg2[%c0_46, %104, %c0_47, %c0_48, %c0_49] : memref<1x8x3x2x32xbf16, #tpu.memory_space<vmem>>, vector<1x1x3x2x32xbf16>
    %106 = vector.shape_cast %105 : vector<1x1x3x2x32xbf16> to vector<3x2x32xbf16>
    %107 = arith.extf %106 : vector<3x2x32xbf16> to vector<3x2x32xf32>
    %108 = arith.truncf %95 : vector<2x32xf32> to vector<2x32xbf16>
    %cst_50 = arith.constant dense<0.000000e+00> : vector<2x32xf32>
    %109 = tpu.matmul %108, %4, %cst_50 {dimension_numbers = #tpu.dot_dimension_numbers<[1], [0], [0], [1], [0, 0, 1, 1], [], []>} : vector<2x32xbf16>, vector<32x32xbf16>, vector<2x32xf32> -> vector<2x32xf32>
    %cst_51 = arith.constant dense<0.000000e+00> : vector<2x32xf32>
    %110 = tpu.matmul %108, %6, %cst_51 {dimension_numbers = #tpu.dot_dimension_numbers<[1], [0], [0], [1], [0, 0, 1, 1], [], []>} : vector<2x32xbf16>, vector<32x32xbf16>, vector<2x32xf32> -> vector<2x32xf32>
    %cst_52 = arith.constant dense<0.000000e+00> : vector<2x32xf32>
    %111 = tpu.matmul %108, %8, %cst_52 {dimension_numbers = #tpu.dot_dimension_numbers<[1], [0], [0], [1], [0, 0, 1, 1], [], []>} : vector<2x32xbf16>, vector<32x32xbf16>, vector<2x32xf32> -> vector<2x32xf32>
    %112 = vector.extract_strided_slice %107 {offsets = [0, 0, 0], sizes = [1, 2, 32], strides = [1, 1, 1]} : vector<3x2x32xf32> to vector<1x2x32xf32>
    %113 = vector.shape_cast %112 : vector<1x2x32xf32> to vector<2x32xf32>
    %114 = arith.addf %113, %109 : vector<2x32xf32>
    %115 = arith.negf %114 : vector<2x32xf32>
    %116 = math.exp %115 : vector<2x32xf32>
    %cst_53 = arith.constant 1.000000e+00 : f32
    %117 = vector.broadcast %cst_53 : f32 to vector<2x32xf32>
    %118 = arith.addf %117, %116 : vector<2x32xf32>
    %119 = arith.divf %117, %118 : vector<2x32xf32>
    %120 = vector.extract_strided_slice %107 {offsets = [1, 0, 0], sizes = [1, 2, 32], strides = [1, 1, 1]} : vector<3x2x32xf32> to vector<1x2x32xf32>
    %121 = vector.shape_cast %120 : vector<1x2x32xf32> to vector<2x32xf32>
    %122 = arith.addf %121, %110 : vector<2x32xf32>
    %123 = arith.negf %122 : vector<2x32xf32>
    %124 = math.exp %123 : vector<2x32xf32>
    %cst_54 = arith.constant 1.000000e+00 : f32
    %125 = vector.broadcast %cst_54 : f32 to vector<2x32xf32>
    %126 = arith.addf %125, %124 : vector<2x32xf32>
    %127 = arith.divf %125, %126 : vector<2x32xf32>
    %128 = vector.extract_strided_slice %107 {offsets = [2, 0, 0], sizes = [1, 2, 32], strides = [1, 1, 1]} : vector<3x2x32xf32> to vector<1x2x32xf32>
    %129 = vector.shape_cast %128 : vector<1x2x32xf32> to vector<2x32xf32>
    %130 = vector.broadcast %10 : vector<1x32xf32> to vector<2x32xf32>
    %131 = arith.addf %111, %130 : vector<2x32xf32>
    %132 = arith.mulf %119, %131 : vector<2x32xf32>
    %133 = arith.addf %129, %132 : vector<2x32xf32>
    %134 = math.tanh %133 : vector<2x32xf32>
    %cst_55 = arith.constant 1.000000e+00 : f32
    %135 = vector.broadcast %cst_55 : f32 to vector<2x32xf32>
    %136 = arith.subf %135, %127 : vector<2x32xf32>
    %137 = arith.mulf %136, %134 : vector<2x32xf32>
    %138 = arith.mulf %127, %95 : vector<2x32xf32>
    %139 = arith.addf %137, %138 : vector<2x32xf32>
    %c0_56 = arith.constant 0 : index
    %140 = arith.index_cast %103 : i32 to index
    %c0_57 = arith.constant 0 : index
    %c0_58 = arith.constant 0 : index
    %141 = vector.load %arg5[%c0_56, %140, %c0_57, %c0_58] : memref<1x8x2x32xf32, #tpu.memory_space<vmem>>, vector<1x1x2x32xf32>
    %142 = vector.shape_cast %141 : vector<1x1x2x32xf32> to vector<2x32xf32>
    %143 = vector.shape_cast %139 : vector<2x32xf32> to vector<1x1x2x32xf32>
    tpu.vector_store %arg5[%c0_56, %140, %c0_57, %c0_58], %143 {strides = array<i32>} : memref<1x8x2x32xf32, #tpu.memory_space<vmem>>, vector<1x1x2x32xf32>,
    %c3_i32 = arith.constant 3 : i32
    %c2_i32_59 = arith.constant 2 : i32
    %144 = arith.muli %c2_i32_59, %c3_i32 : i32
    %c7_i32_60 = arith.constant 7 : i32
    %145 = arith.subi %c7_i32_60, %144 : i32
    %146 = arith.muli %arg0, %145 : i32
    %147 = arith.addi %146, %c3_i32 : i32
    %c0_61 = arith.constant 0 : index
    %148 = arith.index_cast %147 : i32 to index
    %c0_62 = arith.constant 0 : index
    %c0_63 = arith.constant 0 : index
    %c0_64 = arith.constant 0 : index
    %149 = vector.load %arg2[%c0_61, %148, %c0_62, %c0_63, %c0_64] : memref<1x8x3x2x32xbf16, #tpu.memory_space<vmem>>, vector<1x1x3x2x32xbf16>
    %150 = vector.shape_cast %149 : vector<1x1x3x2x32xbf16> to vector<3x2x32xbf16>
    %151 = arith.extf %150 : vector<3x2x32xbf16> to vector<3x2x32xf32>
    %152 = arith.truncf %139 : vector<2x32xf32> to vector<2x32xbf16>
    %cst_65 = arith.constant dense<0.000000e+00> : vector<2x32xf32>
    %153 = tpu.matmul %152, %4, %cst_65 {dimension_numbers = #tpu.dot_dimension_numbers<[1], [0], [0], [1], [0, 0, 1, 1], [], []>} : vector<2x32xbf16>, vector<32x32xbf16>, vector<2x32xf32> -> vector<2x32xf32>
    %cst_66 = arith.constant dense<0.000000e+00> : vector<2x32xf32>
    %154 = tpu.matmul %152, %6, %cst_66 {dimension_numbers = #tpu.dot_dimension_numbers<[1], [0], [0], [1], [0, 0, 1, 1], [], []>} : vector<2x32xbf16>, vector<32x32xbf16>, vector<2x32xf32> -> vector<2x32xf32>
    %cst_67 = arith.constant dense<0.000000e+00> : vector<2x32xf32>
    %155 = tpu.matmul %152, %8, %cst_67 {dimension_numbers = #tpu.dot_dimension_numbers<[1], [0], [0], [1], [0, 0, 1, 1], [], []>} : vector<2x32xbf16>, vector<32x32xbf16>, vector<2x32xf32> -> vector<2x32xf32>
    %156 = vector.extract_strided_slice %151 {offsets = [0, 0, 0], sizes = [1, 2, 32], strides = [1, 1, 1]} : vector<3x2x32xf32> to vector<1x2x32xf32>
    %157 = vector.shape_cast %156 : vector<1x2x32xf32> to vector<2x32xf32>
    %158 = arith.addf %157, %153 : vector<2x32xf32>
    %159 = arith.negf %158 : vector<2x32xf32>
    %160 = math.exp %159 : vector<2x32xf32>
    %cst_68 = arith.constant 1.000000e+00 : f32
    %161 = vector.broadcast %cst_68 : f32 to vector<2x32xf32>
    %162 = arith.addf %161, %160 : vector<2x32xf32>
    %163 = arith.divf %161, %162 : vector<2x32xf32>
    %164 = vector.extract_strided_slice %151 {offsets = [1, 0, 0], sizes = [1, 2, 32], strides = [1, 1, 1]} : vector<3x2x32xf32> to vector<1x2x32xf32>
    %165 = vector.shape_cast %164 : vector<1x2x32xf32> to vector<2x32xf32>
    %166 = arith.addf %165, %154 : vector<2x32xf32>
    %167 = arith.negf %166 : vector<2x32xf32>
    %168 = math.exp %167 : vector<2x32xf32>
    %cst_69 = arith.constant 1.000000e+00 : f32
    %169 = vector.broadcast %cst_69 : f32 to vector<2x32xf32>
    %170 = arith.addf %169, %168 : vector<2x32xf32>
    %171 = arith.divf %169, %170 : vector<2x32xf32>
    %172 = vector.extract_strided_slice %151 {offsets = [2, 0, 0], sizes = [1, 2, 32], strides = [1, 1, 1]} : vector<3x2x32xf32> to vector<1x2x32xf32>
    %173 = vector.shape_cast %172 : vector<1x2x32xf32> to vector<2x32xf32>
    %174 = vector.broadcast %10 : vector<1x32xf32> to vector<2x32xf32>
    %175 = arith.addf %155, %174 : vector<2x32xf32>
    %176 = arith.mulf %163, %175 : vector<2x32xf32>
    %177 = arith.addf %173, %176 : vector<2x32xf32>
    %178 = math.tanh %177 : vector<2x32xf32>
    %cst_70 = arith.constant 1.000000e+00 : f32
    %179 = vector.broadcast %cst_70 : f32 to vector<2x32xf32>
    %180 = arith.subf %179, %171 : vector<2x32xf32>
    %181 = arith.mulf %180, %178 : vector<2x32xf32>
    %182 = arith.mulf %171, %139 : vector<2x32xf32>
    %183 = arith.addf %181, %182 : vector<2x32xf32>
    %c0_71 = arith.constant 0 : index
    %184 = arith.index_cast %147 : i32 to index
    %c0_72 = arith.constant 0 : index
    %c0_73 = arith.constant 0 : index
    %185 = vector.load %arg5[%c0_71, %184, %c0_72, %c0_73] : memref<1x8x2x32xf32, #tpu.memory_space<vmem>>, vector<1x1x2x32xf32>
    %186 = vector.shape_cast %185 : vector<1x1x2x32xf32> to vector<2x32xf32>
    %187 = vector.shape_cast %183 : vector<2x32xf32> to vector<1x1x2x32xf32>
    tpu.vector_store %arg5[%c0_71, %184, %c0_72, %c0_73], %187 {strides = array<i32>} : memref<1x8x2x32xf32, #tpu.memory_space<vmem>>, vector<1x1x2x32xf32>,
    %c4_i32 = arith.constant 4 : i32
    %c2_i32_74 = arith.constant 2 : i32
    %188 = arith.muli %c2_i32_74, %c4_i32 : i32
    %c7_i32_75 = arith.constant 7 : i32
    %189 = arith.subi %c7_i32_75, %188 : i32
    %190 = arith.muli %arg0, %189 : i32
    %191 = arith.addi %190, %c4_i32 : i32
    %c0_76 = arith.constant 0 : index
    %192 = arith.index_cast %191 : i32 to index
    %c0_77 = arith.constant 0 : index
    %c0_78 = arith.constant 0 : index
    %c0_79 = arith.constant 0 : index
    %193 = vector.load %arg2[%c0_76, %192, %c0_77, %c0_78, %c0_79] : memref<1x8x3x2x32xbf16, #tpu.memory_space<vmem>>, vector<1x1x3x2x32xbf16>
    %194 = vector.shape_cast %193 : vector<1x1x3x2x32xbf16> to vector<3x2x32xbf16>
    %195 = arith.extf %194 : vector<3x2x32xbf16> to vector<3x2x32xf32>
    %196 = arith.truncf %183 : vector<2x32xf32> to vector<2x32xbf16>
    %cst_80 = arith.constant dense<0.000000e+00> : vector<2x32xf32>
    %197 = tpu.matmul %196, %4, %cst_80 {dimension_numbers = #tpu.dot_dimension_numbers<[1], [0], [0], [1], [0, 0, 1, 1], [], []>} : vector<2x32xbf16>, vector<32x32xbf16>, vector<2x32xf32> -> vector<2x32xf32>
    %cst_81 = arith.constant dense<0.000000e+00> : vector<2x32xf32>
    %198 = tpu.matmul %196, %6, %cst_81 {dimension_numbers = #tpu.dot_dimension_numbers<[1], [0], [0], [1], [0, 0, 1, 1], [], []>} : vector<2x32xbf16>, vector<32x32xbf16>, vector<2x32xf32> -> vector<2x32xf32>
    %cst_82 = arith.constant dense<0.000000e+00> : vector<2x32xf32>
    %199 = tpu.matmul %196, %8, %cst_82 {dimension_numbers = #tpu.dot_dimension_numbers<[1], [0], [0], [1], [0, 0, 1, 1], [], []>} : vector<2x32xbf16>, vector<32x32xbf16>, vector<2x32xf32> -> vector<2x32xf32>
    %200 = vector.extract_strided_slice %195 {offsets = [0, 0, 0], sizes = [1, 2, 32], strides = [1, 1, 1]} : vector<3x2x32xf32> to vector<1x2x32xf32>
    %201 = vector.shape_cast %200 : vector<1x2x32xf32> to vector<2x32xf32>
    %202 = arith.addf %201, %197 : vector<2x32xf32>
    %203 = arith.negf %202 : vector<2x32xf32>
    %204 = math.exp %203 : vector<2x32xf32>
    %cst_83 = arith.constant 1.000000e+00 : f32
    %205 = vector.broadcast %cst_83 : f32 to vector<2x32xf32>
    %206 = arith.addf %205, %204 : vector<2x32xf32>
    %207 = arith.divf %205, %206 : vector<2x32xf32>
    %208 = vector.extract_strided_slice %195 {offsets = [1, 0, 0], sizes = [1, 2, 32], strides = [1, 1, 1]} : vector<3x2x32xf32> to vector<1x2x32xf32>
    %209 = vector.shape_cast %208 : vector<1x2x32xf32> to vector<2x32xf32>
    %210 = arith.addf %209, %198 : vector<2x32xf32>
    %211 = arith.negf %210 : vector<2x32xf32>
    %212 = math.exp %211 : vector<2x32xf32>
    %cst_84 = arith.constant 1.000000e+00 : f32
    %213 = vector.broadcast %cst_84 : f32 to vector<2x32xf32>
    %214 = arith.addf %213, %212 : vector<2x32xf32>
    %215 = arith.divf %213, %214 : vector<2x32xf32>
    %216 = vector.extract_strided_slice %195 {offsets = [2, 0, 0], sizes = [1, 2, 32], strides = [1, 1, 1]} : vector<3x2x32xf32> to vector<1x2x32xf32>
    %217 = vector.shape_cast %216 : vector<1x2x32xf32> to vector<2x32xf32>
    %218 = vector.broadcast %10 : vector<1x32xf32> to vector<2x32xf32>
    %219 = arith.addf %199, %218 : vector<2x32xf32>
    %220 = arith.mulf %207, %219 : vector<2x32xf32>
    %221 = arith.addf %217, %220 : vector<2x32xf32>
    %222 = math.tanh %221 : vector<2x32xf32>
    %cst_85 = arith.constant 1.000000e+00 : f32
    %223 = vector.broadcast %cst_85 : f32 to vector<2x32xf32>
    %224 = arith.subf %223, %215 : vector<2x32xf32>
    %225 = arith.mulf %224, %222 : vector<2x32xf32>
    %226 = arith.mulf %215, %183 : vector<2x32xf32>
    %227 = arith.addf %225, %226 : vector<2x32xf32>
    %c0_86 = arith.constant 0 : index
    %228 = arith.index_cast %191 : i32 to index
    %c0_87 = arith.constant 0 : index
    %c0_88 = arith.constant 0 : index
    %229 = vector.load %arg5[%c0_86, %228, %c0_87, %c0_88] : memref<1x8x2x32xf32, #tpu.memory_space<vmem>>, vector<1x1x2x32xf32>
    %230 = vector.shape_cast %229 : vector<1x1x2x32xf32> to vector<2x32xf32>
    %231 = vector.shape_cast %227 : vector<2x32xf32> to vector<1x1x2x32xf32>
    tpu.vector_store %arg5[%c0_86, %228, %c0_87, %c0_88], %231 {strides = array<i32>} : memref<1x8x2x32xf32, #tpu.memory_space<vmem>>, vector<1x1x2x32xf32>,
    %c5_i32 = arith.constant 5 : i32
    %c2_i32_89 = arith.constant 2 : i32
    %232 = arith.muli %c2_i32_89, %c5_i32 : i32
    %c7_i32_90 = arith.constant 7 : i32
    %233 = arith.subi %c7_i32_90, %232 : i32
    %234 = arith.muli %arg0, %233 : i32
    %235 = arith.addi %234, %c5_i32 : i32
    %c0_91 = arith.constant 0 : index
    %236 = arith.index_cast %235 : i32 to index
    %c0_92 = arith.constant 0 : index
    %c0_93 = arith.constant 0 : index
    %c0_94 = arith.constant 0 : index
    %237 = vector.load %arg2[%c0_91, %236, %c0_92, %c0_93, %c0_94] : memref<1x8x3x2x32xbf16, #tpu.memory_space<vmem>>, vector<1x1x3x2x32xbf16>
    %238 = vector.shape_cast %237 : vector<1x1x3x2x32xbf16> to vector<3x2x32xbf16>
    %239 = arith.extf %238 : vector<3x2x32xbf16> to vector<3x2x32xf32>
    %240 = arith.truncf %227 : vector<2x32xf32> to vector<2x32xbf16>
    %cst_95 = arith.constant dense<0.000000e+00> : vector<2x32xf32>
    %241 = tpu.matmul %240, %4, %cst_95 {dimension_numbers = #tpu.dot_dimension_numbers<[1], [0], [0], [1], [0, 0, 1, 1], [], []>} : vector<2x32xbf16>, vector<32x32xbf16>, vector<2x32xf32> -> vector<2x32xf32>
    %cst_96 = arith.constant dense<0.000000e+00> : vector<2x32xf32>
    %242 = tpu.matmul %240, %6, %cst_96 {dimension_numbers = #tpu.dot_dimension_numbers<[1], [0], [0], [1], [0, 0, 1, 1], [], []>} : vector<2x32xbf16>, vector<32x32xbf16>, vector<2x32xf32> -> vector<2x32xf32>
    %cst_97 = arith.constant dense<0.000000e+00> : vector<2x32xf32>
    %243 = tpu.matmul %240, %8, %cst_97 {dimension_numbers = #tpu.dot_dimension_numbers<[1], [0], [0], [1], [0, 0, 1, 1], [], []>} : vector<2x32xbf16>, vector<32x32xbf16>, vector<2x32xf32> -> vector<2x32xf32>
    %244 = vector.extract_strided_slice %239 {offsets = [0, 0, 0], sizes = [1, 2, 32], strides = [1, 1, 1]} : vector<3x2x32xf32> to vector<1x2x32xf32>
    %245 = vector.shape_cast %244 : vector<1x2x32xf32> to vector<2x32xf32>
    %246 = arith.addf %245, %241 : vector<2x32xf32>
    %247 = arith.negf %246 : vector<2x32xf32>
    %248 = math.exp %247 : vector<2x32xf32>
    %cst_98 = arith.constant 1.000000e+00 : f32
    %249 = vector.broadcast %cst_98 : f32 to vector<2x32xf32>
    %250 = arith.addf %249, %248 : vector<2x32xf32>
    %251 = arith.divf %249, %250 : vector<2x32xf32>
    %252 = vector.extract_strided_slice %239 {offsets = [1, 0, 0], sizes = [1, 2, 32], strides = [1, 1, 1]} : vector<3x2x32xf32> to vector<1x2x32xf32>
    %253 = vector.shape_cast %252 : vector<1x2x32xf32> to vector<2x32xf32>
    %254 = arith.addf %253, %242 : vector<2x32xf32>
    %255 = arith.negf %254 : vector<2x32xf32>
    %256 = math.exp %255 : vector<2x32xf32>
    %cst_99 = arith.constant 1.000000e+00 : f32
    %257 = vector.broadcast %cst_99 : f32 to vector<2x32xf32>
    %258 = arith.addf %257, %256 : vector<2x32xf32>
    %259 = arith.divf %257, %258 : vector<2x32xf32>
    %260 = vector.extract_strided_slice %239 {offsets = [2, 0, 0], sizes = [1, 2, 32], strides = [1, 1, 1]} : vector<3x2x32xf32> to vector<1x2x32xf32>
    %261 = vector.shape_cast %260 : vector<1x2x32xf32> to vector<2x32xf32>
    %262 = vector.broadcast %10 : vector<1x32xf32> to vector<2x32xf32>
    %263 = arith.addf %243, %262 : vector<2x32xf32>
    %264 = arith.mulf %251, %263 : vector<2x32xf32>
    %265 = arith.addf %261, %264 : vector<2x32xf32>
    %266 = math.tanh %265 : vector<2x32xf32>
    %cst_100 = arith.constant 1.000000e+00 : f32
    %267 = vector.broadcast %cst_100 : f32 to vector<2x32xf32>
    %268 = arith.subf %267, %259 : vector<2x32xf32>
    %269 = arith.mulf %268, %266 : vector<2x32xf32>
    %270 = arith.mulf %259, %227 : vector<2x32xf32>
    %271 = arith.addf %269, %270 : vector<2x32xf32>
    %c0_101 = arith.constant 0 : index
    %272 = arith.index_cast %235 : i32 to index
    %c0_102 = arith.constant 0 : index
    %c0_103 = arith.constant 0 : index
    %273 = vector.load %arg5[%c0_101, %272, %c0_102, %c0_103] : memref<1x8x2x32xf32, #tpu.memory_space<vmem>>, vector<1x1x2x32xf32>
    %274 = vector.shape_cast %273 : vector<1x1x2x32xf32> to vector<2x32xf32>
    %275 = vector.shape_cast %271 : vector<2x32xf32> to vector<1x1x2x32xf32>
    tpu.vector_store %arg5[%c0_101, %272, %c0_102, %c0_103], %275 {strides = array<i32>} : memref<1x8x2x32xf32, #tpu.memory_space<vmem>>, vector<1x1x2x32xf32>,
    %c6_i32 = arith.constant 6 : i32
    %c2_i32_104 = arith.constant 2 : i32
    %276 = arith.muli %c2_i32_104, %c6_i32 : i32
    %c7_i32_105 = arith.constant 7 : i32
    %277 = arith.subi %c7_i32_105, %276 : i32
    %278 = arith.muli %arg0, %277 : i32
    %279 = arith.addi %278, %c6_i32 : i32
    %c0_106 = arith.constant 0 : index
    %280 = arith.index_cast %279 : i32 to index
    %c0_107 = arith.constant 0 : index
    %c0_108 = arith.constant 0 : index
    %c0_109 = arith.constant 0 : index
    %281 = vector.load %arg2[%c0_106, %280, %c0_107, %c0_108, %c0_109] : memref<1x8x3x2x32xbf16, #tpu.memory_space<vmem>>, vector<1x1x3x2x32xbf16>
    %282 = vector.shape_cast %281 : vector<1x1x3x2x32xbf16> to vector<3x2x32xbf16>
    %283 = arith.extf %282 : vector<3x2x32xbf16> to vector<3x2x32xf32>
    %284 = arith.truncf %271 : vector<2x32xf32> to vector<2x32xbf16>
    %cst_110 = arith.constant dense<0.000000e+00> : vector<2x32xf32>
    %285 = tpu.matmul %284, %4, %cst_110 {dimension_numbers = #tpu.dot_dimension_numbers<[1], [0], [0], [1], [0, 0, 1, 1], [], []>} : vector<2x32xbf16>, vector<32x32xbf16>, vector<2x32xf32> -> vector<2x32xf32>
    %cst_111 = arith.constant dense<0.000000e+00> : vector<2x32xf32>
    %286 = tpu.matmul %284, %6, %cst_111 {dimension_numbers = #tpu.dot_dimension_numbers<[1], [0], [0], [1], [0, 0, 1, 1], [], []>} : vector<2x32xbf16>, vector<32x32xbf16>, vector<2x32xf32> -> vector<2x32xf32>
    %cst_112 = arith.constant dense<0.000000e+00> : vector<2x32xf32>
    %287 = tpu.matmul %284, %8, %cst_112 {dimension_numbers = #tpu.dot_dimension_numbers<[1], [0], [0], [1], [0, 0, 1, 1], [], []>} : vector<2x32xbf16>, vector<32x32xbf16>, vector<2x32xf32> -> vector<2x32xf32>
    %288 = vector.extract_strided_slice %283 {offsets = [0, 0, 0], sizes = [1, 2, 32], strides = [1, 1, 1]} : vector<3x2x32xf32> to vector<1x2x32xf32>
    %289 = vector.shape_cast %288 : vector<1x2x32xf32> to vector<2x32xf32>
    %290 = arith.addf %289, %285 : vector<2x32xf32>
    %291 = arith.negf %290 : vector<2x32xf32>
    %292 = math.exp %291 : vector<2x32xf32>
    %cst_113 = arith.constant 1.000000e+00 : f32
    %293 = vector.broadcast %cst_113 : f32 to vector<2x32xf32>
    %294 = arith.addf %293, %292 : vector<2x32xf32>
    %295 = arith.divf %293, %294 : vector<2x32xf32>
    %296 = vector.extract_strided_slice %283 {offsets = [1, 0, 0], sizes = [1, 2, 32], strides = [1, 1, 1]} : vector<3x2x32xf32> to vector<1x2x32xf32>
    %297 = vector.shape_cast %296 : vector<1x2x32xf32> to vector<2x32xf32>
    %298 = arith.addf %297, %286 : vector<2x32xf32>
    %299 = arith.negf %298 : vector<2x32xf32>
    %300 = math.exp %299 : vector<2x32xf32>
    %cst_114 = arith.constant 1.000000e+00 : f32
    %301 = vector.broadcast %cst_114 : f32 to vector<2x32xf32>
    %302 = arith.addf %301, %300 : vector<2x32xf32>
    %303 = arith.divf %301, %302 : vector<2x32xf32>
    %304 = vector.extract_strided_slice %283 {offsets = [2, 0, 0], sizes = [1, 2, 32], strides = [1, 1, 1]} : vector<3x2x32xf32> to vector<1x2x32xf32>
    %305 = vector.shape_cast %304 : vector<1x2x32xf32> to vector<2x32xf32>
    %306 = vector.broadcast %10 : vector<1x32xf32> to vector<2x32xf32>
    %307 = arith.addf %287, %306 : vector<2x32xf32>
    %308 = arith.mulf %295, %307 : vector<2x32xf32>
    %309 = arith.addf %305, %308 : vector<2x32xf32>
    %310 = math.tanh %309 : vector<2x32xf32>
    %cst_115 = arith.constant 1.000000e+00 : f32
    %311 = vector.broadcast %cst_115 : f32 to vector<2x32xf32>
    %312 = arith.subf %311, %303 : vector<2x32xf32>
    %313 = arith.mulf %312, %310 : vector<2x32xf32>
    %314 = arith.mulf %303, %271 : vector<2x32xf32>
    %315 = arith.addf %313, %314 : vector<2x32xf32>
    %c0_116 = arith.constant 0 : index
    %316 = arith.index_cast %279 : i32 to index
    %c0_117 = arith.constant 0 : index
    %c0_118 = arith.constant 0 : index
    %317 = vector.load %arg5[%c0_116, %316, %c0_117, %c0_118] : memref<1x8x2x32xf32, #tpu.memory_space<vmem>>, vector<1x1x2x32xf32>
    %318 = vector.shape_cast %317 : vector<1x1x2x32xf32> to vector<2x32xf32>
    %319 = vector.shape_cast %315 : vector<2x32xf32> to vector<1x1x2x32xf32>
    tpu.vector_store %arg5[%c0_116, %316, %c0_117, %c0_118], %319 {strides = array<i32>} : memref<1x8x2x32xf32, #tpu.memory_space<vmem>>, vector<1x1x2x32xf32>,
    %c7_i32_119 = arith.constant 7 : i32
    %c2_i32_120 = arith.constant 2 : i32
    %320 = arith.muli %c2_i32_120, %c7_i32_119 : i32
    %c7_i32_121 = arith.constant 7 : i32
    %321 = arith.subi %c7_i32_121, %320 : i32
    %322 = arith.muli %arg0, %321 : i32
    %323 = arith.addi %322, %c7_i32_119 : i32
    %c0_122 = arith.constant 0 : index
    %324 = arith.index_cast %323 : i32 to index
    %c0_123 = arith.constant 0 : index
    %c0_124 = arith.constant 0 : index
    %c0_125 = arith.constant 0 : index
    %325 = vector.load %arg2[%c0_122, %324, %c0_123, %c0_124, %c0_125] : memref<1x8x3x2x32xbf16, #tpu.memory_space<vmem>>, vector<1x1x3x2x32xbf16>
    %326 = vector.shape_cast %325 : vector<1x1x3x2x32xbf16> to vector<3x2x32xbf16>
    %327 = arith.extf %326 : vector<3x2x32xbf16> to vector<3x2x32xf32>
    %328 = arith.truncf %315 : vector<2x32xf32> to vector<2x32xbf16>
    %cst_126 = arith.constant dense<0.000000e+00> : vector<2x32xf32>
    %329 = tpu.matmul %328, %4, %cst_126 {dimension_numbers = #tpu.dot_dimension_numbers<[1], [0], [0], [1], [0, 0, 1, 1], [], []>} : vector<2x32xbf16>, vector<32x32xbf16>, vector<2x32xf32> -> vector<2x32xf32>
    %cst_127 = arith.constant dense<0.000000e+00> : vector<2x32xf32>
    %330 = tpu.matmul %328, %6, %cst_127 {dimension_numbers = #tpu.dot_dimension_numbers<[1], [0], [0], [1], [0, 0, 1, 1], [], []>} : vector<2x32xbf16>, vector<32x32xbf16>, vector<2x32xf32> -> vector<2x32xf32>
    %cst_128 = arith.constant dense<0.000000e+00> : vector<2x32xf32>
    %331 = tpu.matmul %328, %8, %cst_128 {dimension_numbers = #tpu.dot_dimension_numbers<[1], [0], [0], [1], [0, 0, 1, 1], [], []>} : vector<2x32xbf16>, vector<32x32xbf16>, vector<2x32xf32> -> vector<2x32xf32>
    %332 = vector.extract_strided_slice %327 {offsets = [0, 0, 0], sizes = [1, 2, 32], strides = [1, 1, 1]} : vector<3x2x32xf32> to vector<1x2x32xf32>
    %333 = vector.shape_cast %332 : vector<1x2x32xf32> to vector<2x32xf32>
    %334 = arith.addf %333, %329 : vector<2x32xf32>
    %335 = arith.negf %334 : vector<2x32xf32>
    %336 = math.exp %335 : vector<2x32xf32>
    %cst_129 = arith.constant 1.000000e+00 : f32
    %337 = vector.broadcast %cst_129 : f32 to vector<2x32xf32>
    %338 = arith.addf %337, %336 : vector<2x32xf32>
    %339 = arith.divf %337, %338 : vector<2x32xf32>
    %340 = vector.extract_strided_slice %327 {offsets = [1, 0, 0], sizes = [1, 2, 32], strides = [1, 1, 1]} : vector<3x2x32xf32> to vector<1x2x32xf32>
    %341 = vector.shape_cast %340 : vector<1x2x32xf32> to vector<2x32xf32>
    %342 = arith.addf %341, %330 : vector<2x32xf32>
    %343 = arith.negf %342 : vector<2x32xf32>
    %344 = math.exp %343 : vector<2x32xf32>
    %cst_130 = arith.constant 1.000000e+00 : f32
    %345 = vector.broadcast %cst_130 : f32 to vector<2x32xf32>
    %346 = arith.addf %345, %344 : vector<2x32xf32>
    %347 = arith.divf %345, %346 : vector<2x32xf32>
    %348 = vector.extract_strided_slice %327 {offsets = [2, 0, 0], sizes = [1, 2, 32], strides = [1, 1, 1]} : vector<3x2x32xf32> to vector<1x2x32xf32>
    %349 = vector.shape_cast %348 : vector<1x2x32xf32> to vector<2x32xf32>
    %350 = vector.broadcast %10 : vector<1x32xf32> to vector<2x32xf32>
    %351 = arith.addf %331, %350 : vector<2x32xf32>
    %352 = arith.mulf %339, %351 : vector<2x32xf32>
    %353 = arith.addf %349, %352 : vector<2x32xf32>
    %354 = math.tanh %353 : vector<2x32xf32>
    %cst_131 = arith.constant 1.000000e+00 : f32
    %355 = vector.broadcast %cst_131 : f32 to vector<2x32xf32>
    %356 = arith.subf %355, %347 : vector<2x32xf32>
    %357 = arith.mulf %356, %354 : vector<2x32xf32>
    %358 = arith.mulf %347, %315 : vector<2x32xf32>
    %359 = arith.addf %357, %358 : vector<2x32xf32>
    %c0_132 = arith.constant 0 : index
    %360 = arith.index_cast %323 : i32 to index
    %c0_133 = arith.constant 0 : index
    %c0_134 = arith.constant 0 : index
    %361 = vector.load %arg5[%c0_132, %360, %c0_133, %c0_134] : memref<1x8x2x32xf32, #tpu.memory_space<vmem>>, vector<1x1x2x32xf32>
    %362 = vector.shape_cast %361 : vector<1x1x2x32xf32> to vector<2x32xf32>
    %363 = vector.shape_cast %359 : vector<2x32xf32> to vector<1x1x2x32xf32>
    tpu.vector_store %arg5[%c0_132, %360, %c0_133, %c0_134], %363 {strides = array<i32>} : memref<1x8x2x32xf32, #tpu.memory_space<vmem>>, vector<1x1x2x32xf32>,
    %c8_i32 = arith.constant 8 : i32
    %c0_135 = arith.constant 0 : index
    %c0_136 = arith.constant 0 : index
    %364 = vector.load %arg7[%c0_135, %c0_136] : memref<2x32xf32, #tpu.memory_space<vmem>>, vector<2x32xf32>
    tpu.vector_store %arg7[%c0_135, %c0_136], %359 {strides = array<i32>} : memref<2x32xf32, #tpu.memory_space<vmem>>, vector<2x32xf32>,
    %c0_i32_137 = arith.constant 0 : i32
    %365 = arith.cmpi eq, %arg1, %c0_i32_137 : i32
    %366 = arith.extui %365 : i1 to i32
    %c0_i32_138 = arith.constant 0 : i32
    %367 = arith.cmpi ne, %366, %c0_i32_138 : i32
    scf.if %367 {
      %c0_139 = arith.constant 0 : index
      %c0_140 = arith.constant 0 : index
      %c0_141 = arith.constant 0 : index
      %368 = vector.load %arg6[%c0_139, %c0_140, %c0_141] : memref<1x2x32xf32, #tpu.memory_space<vmem>>, vector<1x2x32xf32>
      %369 = vector.shape_cast %368 : vector<1x2x32xf32> to vector<2x32xf32>
      %370 = vector.shape_cast %359 : vector<2x32xf32> to vector<1x2x32xf32>
      tpu.vector_store %arg6[%c0_139, %c0_140, %c0_141], %370 {strides = array<i32>} : memref<1x2x32xf32, #tpu.memory_space<vmem>>, vector<1x2x32xf32>,
    } else {
    }
    return
  }
  func.func @transform_0(%arg0: i32, %arg1: i32) -> (i32, i32, i32, i32, i32) {
    %c0_i32 = arith.constant 0 : i32
    %0 = arith.muli %arg0, %c0_i32 : i32
    %c2_i32 = arith.constant 2 : i32
    %1 = arith.muli %c2_i32, %arg0 : i32
    %c1_i32 = arith.constant 1 : i32
    %2 = arith.subi %c1_i32, %1 : i32
    %3 = arith.muli %2, %arg1 : i32
    %4 = arith.addi %0, %3 : i32
    %c0_i32_0 = arith.constant 0 : i32
    %c0_i32_1 = arith.constant 0 : i32
    %c0_i32_2 = arith.constant 0 : i32
    %c0_i32_3 = arith.constant 0 : i32
    return %arg0, %4, %c0_i32_0, %c0_i32_1, %c0_i32_2 : i32, i32, i32, i32, i32
  }
  func.func @transform_1(%arg0: i32, %arg1: i32) -> (i32, i32, i32, i32) {
    %c0_i32 = arith.constant 0 : i32
    %c0_i32_0 = arith.constant 0 : i32
    %c0_i32_1 = arith.constant 0 : i32
    %c0_i32_2 = arith.constant 0 : i32
    return %arg0, %c0_i32, %c0_i32_0, %c0_i32_1 : i32, i32, i32, i32
  }
  func.func @transform_2(%arg0: i32, %arg1: i32) -> (i32, i32, i32) {
    %c0_i32 = arith.constant 0 : i32
    %c0_i32_0 = arith.constant 0 : i32
    %c0_i32_1 = arith.constant 0 : i32
    return %arg0, %c0_i32, %c0_i32_0 : i32, i32, i32
  }
  func.func @transform_3(%arg0: i32, %arg1: i32) -> (i32, i32, i32, i32) {
    %c0_i32 = arith.constant 0 : i32
    %0 = arith.muli %arg0, %c0_i32 : i32
    %c2_i32 = arith.constant 2 : i32
    %1 = arith.muli %c2_i32, %arg0 : i32
    %c1_i32 = arith.constant 1 : i32
    %2 = arith.subi %c1_i32, %1 : i32
    %3 = arith.muli %2, %arg1 : i32
    %4 = arith.addi %0, %3 : i32
    %c0_i32_0 = arith.constant 0 : i32
    %c0_i32_1 = arith.constant 0 : i32
    %c0_i32_2 = arith.constant 0 : i32
    return %arg0, %4, %c0_i32_0, %c0_i32_1 : i32, i32, i32, i32
  }
  func.func @transform_4(%arg0: i32, %arg1: i32) -> (i32, i32, i32) {
    %c0_i32 = arith.constant 0 : i32
    %c0_i32_0 = arith.constant 0 : i32
    %c0_i32_1 = arith.constant 0 : i32
    return %arg0, %c0_i32, %c0_i32_0 : i32, i32, i32
  }
}

</mosaic_0001>

<bundles_post_ra>
// kernel: encoder_forward.2
= control target key start
LH: loop header
LB: loop body
LE: loop exit
PB: predicated region body
PF: predicated region fallthrough
CT: control target
= control target key end

     0   :  { %s1703_s15 = smov 0   ;;  %s1705_s16 = smov 0   ;;  %s1980_s0 = inlined_call_operand.vmem [shape: bf16[2,8,3,2,32], index: 0, kind: input, shape index: {}]   ;;  %s1981_s1 = inlined_call_operand.vmem [shape: bf16[2,3,32,32], index: 1, kind: input, shape index: {}]   ;;  %s1982_s2 = inlined_call_operand.vmem [shape: f32[2,1,32], index: 2, kind: input, shape index: {}]   ;;  %s1983_s3 = inlined_call_operand.vmem [shape: f32[2,8,2,32], index: 3, kind: output, shape index: {0}]   ;;  %s1984_s4 = inlined_call_operand.vmem [shape: f32[2,2,32], index: 4, kind: output, shape index: {1}]  }
   0x1   :  { %s1707_s17 = smov 0  }
   0x2 LB: > { %s27_s18 = sadd.s32 1, %s1671_s16  ;;  %p1418_p0 = scmp.ge.s32.totalorder %s1675_s17, 1  ;;  %s1675_s17 = sphi %s1707_s17, %s15_s17   ;;  %s1671_s16 = sphi %s1705_s16, %s1986_s16   ;;  %s1667_s15 = sphi %s1703_s15, %s1985_s15  }
   0x3   : > { %p29_p1 = scmp.ge.s32.totalorder %s27_s18, 2  ;;  %p222_p2 = scmp.lt.s32.totalorder %s1675_s17, 3 }
   0x5   : > { %s1988_s18 = smov (%p29_p1, %s27_s18), 0  ;;  %p223_p3 = pnand %p1418_p0, %p222_p2 }
   0x6   : > { %p278_p4 = scmp.lt.s32.totalorder (!%p223_p3), %s1667_s15, 1  ;;  %s1433_s28 = smul.u32 (!%p223_p3), 21, %s1667_s15 }
   0x7   : > { %226 = sbr.rel (%p223_p3) target bundleno = 1434 (0x59a), region = 32  ;;  %s1494_s29 = sshll.u32 (!%p223_p3), %s1667_s15, 1 }
   0x8   : > { %s1463_s8 = smul.u32 (!%p223_p3), 14, %s1667_s15 }
   0x9   : > { %s1464_s13 = smul.u32 (!%p223_p3), 15, %s1667_s15 }
   0xa   : > { %s1475_s22 = smul.u32 (!%p223_p3), 9, %s1667_s15 }
   0xb   : > { %s1484_s24 = smul.u32 (!%p223_p3), 6, %s1667_s15 }
   0xc   : > { %vm323_vm0 = vcmask 254976   ;;  %v1677_v0 = vmov 0.0   ;;  %s1726_s19 = scalar_select %p278_p4, %s1667_s15, 1  ;;  %vm363_vm1 = vcmask 261120  }
   0xd   : > { %324 = vst.msk [vmem:[#allocation2] sm:$0x3] %vm323_vm0, %v1677_v0 }
   0xe   : > { %s1545_s20 = smul.u32 48, %s1726_s19  ;;  %s1777_s26 = scalar_lea.vmem %s1982_s2, %s1726_s19 }
   0xf   : > { %s1544_s27 = smul.u32 24, %s1726_s19  ;;  %v1792_v32 = vld [vmem:[%s1777_s26] ss:$0 sm:$0xff]  ;;  %s1537_s7 = sshll.u32 %s1726_s19, 4 }
  0x10   : > { %s294_s23 = scalar_lea.vmem %s1981_s1, %s1545_s20  ;;  %s1801_s11 = scalar_lea.vmem %s1983_s3, %s1537_s7 }
  0x11   : > { %v1732_v1 = vld [vmem:[%s294_s23 + $0x8] sm:$0xff]  ;;  %v1734_v2 = vld [vmem:[%s294_s23 + $0x18] sm:$0xff]  ;;  %v1740_v4 = vld [vmem:[%s294_s23] sm:$0xff]  ;;  %s1784_s5 = scalar_lea.vmem %s1980_s0, %s1544_s27  ;;  %s481_s12 = scalar_lea.vmem %s1801_s11, %s1463_s8 }
  0x12   : > { %v1736_v3 = vld [vmem:[%s294_s23 + $0x28] sm:$0xff]  ;;  %373 = vmatpush.bf16.msra.mxu0 %v1732_v1  ;;  %398 = vmatpush.bf16.msra.mxu1 %v1734_v2  ;;  %v1742_v5 = vld [vmem:[%s294_s23 + $0x10] sm:$0xff]  ;;  %v1747_v7 = vld [vmem:[%s294_s23 + $0x20] sm:$0xff]  ;;  %s1787_s6 = scalar_lea.vmem %s1784_s5, %s1433_s28  ;;  %s1822_s14 = scalar_lea.vmem %s1784_s5, %s1464_s13 }
  0x13   : > { %466 = vmatpush.bf16.msra.mxu2 %v1736_v3  ;;  %504 = vmatpush.bf16.msra.mxu3 %v1732_v1  ;;  %v344_v9 = vld [vmem:[%s1787_s6] sm:$0x1]  ;;  %v345_v10 = vld [vmem:[%s1787_s6 + $0x1] sm:$0x1]  ;;  %v346_v38 = vld [vmem:[%s1787_s6 + $0x2] sm:$0x1]  ;;  %s1848_s23 = scalar_lea.vmem %s1784_s5, %s1475_s22  ;;  %s1312_s25 = scalar_lea.vmem %s1801_s11, %s1484_s24 }
  0x14   : > { %v1744_v6 = vld [vmem:[#allocation2] sm:$0x3]  ;;  %v347_v11 = vunpack.c.l.bf16 %v344_v9  ;;  %v348_v12 = vunpack.c.l.bf16 %v345_v10  ;;  %v349_v42 = vunpack.c.l.bf16 %v346_v38  ;;  %v1466_v59 = vld [vmem:[%s1822_s14 + $0x4] sm:$0x1]  ;;  %v1465_v62 = vld [vmem:[%s1822_s14 + $0x3] sm:$0x1]  ;;  %s1318_s30 = scalar_lea.vmem %s1801_s11, %s1494_s29 }
  0x15   : > { %v350_v8 = vpack.c.bf16 %v1744_v6, %v1744_v6  ;;  %v492_v60 = vunpack.c.l.bf16 %v1466_v59  ;;  %s1473_s20 = smul.u32 10, %s1667_s15  ;;  %s792_s6 = ssub.s32 4, %s1667_s15 }
  0x16   : > { %374 = vmatpush.bf16.msra.mxu0 %v1740_v4  ;;  %399 = vmatpush.bf16.msra.mxu1 %v1742_v5  ;;  %s1314_s27 = smul.u32 3, %s1667_s15  ;;  %s1501_s9 = sshll.u32 %s792_s6, 1 }
  0x17   : > { %467 = vmatpush.bf16.msra.mxu2 %v1747_v7  ;;  %505 = vmatpush.bf16.msra.mxu3 %v1740_v4  ;;  %s1304_s21 = scalar_lea.vmem %s1801_s11, %s1473_s20  ;;  %s793_s7 = smul.u32 3, %s792_s6 }
  0x18   : > { %s1315_s28 = scalar_lea.vmem %s1784_s5, %s1314_s27  ;;  %s892_s10 = scalar_lea.vmem %s1801_s11, %s1501_s9 }
  0x19   : > { %1442 = vmatmul.msk.bf16.vlgmr.msra.gmra.mxu0 %vm363_vm1, %v350_v8  ;;  %1451 = vmatmul.msk.bf16.vlgmr.msra.gmra.mxu1 %vm363_vm1, %v350_v8  ;;  %s1897_s8 = scalar_lea.vmem %s1784_s5, %s793_s7 }
  0x1a   : > { %517 = vmatpush.bf16.msrb.mxu0 %v1734_v2  ;;  %570 = vmatpush.bf16.msrb.mxu1 %v1736_v3 }
  0x1b   : > { %1462 = vmatmul.msk.bf16.vlgmr.msra.gmra.mxu2 %vm363_vm1, %v350_v8  ;;  %620 = vmatpush.bf16.msrb.mxu3 %v1734_v2  ;;  %v491_v8 = vunpack.c.l.bf16 %v1465_v62 }
  0x1c   : > { %607 = vmatpush.bf16.msrb.mxu2 %v1732_v1 }
  0x1e   : > { %518 = vmatpush.bf16.msrb.mxu0 %v1742_v5  ;;  %571 = vmatpush.bf16.msrb.mxu1 %v1747_v7 }
  0x1f   : > { %621 = vmatpush.bf16.msrb.mxu3 %v1742_v5 }
  0x20   : > { %608 = vmatpush.bf16.msrb.mxu2 %v1740_v4 }
  0x22   : > { %673 = vmatpush.bf16.msra.mxu0 %v1736_v3  ;;  %709 = vmatpush.bf16.msra.mxu1 %v1732_v1 }
  0x24   : > { %722 = vmatpush.bf16.msra.mxu2 %v1734_v2 }
  0x26   : > { %674 = vmatpush.bf16.msra.mxu0 %v1747_v7  ;;  %710 = vmatpush.bf16.msra.mxu1 %v1740_v4 }
  0x28   : > { %723 = vmatpush.bf16.msra.mxu2 %v1742_v5 }
  0x96   : > { %v376_v13 = vpop.f32.mrf.mxu0  ;;  %v401_v14 = vpop.f32.mrf.mxu1 }
  0x97   : > { %v405_v15 = vadd.f32 %v376_v13, %v347_v11  ;;  %v425_v16 = vadd.f32 %v401_v14, %v348_v12 }
  0x99   : > { %v1452_v17 = vmul.f32 -1.442695, %v405_v15  ;;  %v1453_v18 = vmul.f32 -1.442695, %v425_v16 }
  0x9b   : > { %1572 = vpow2.f32 %v1452_v17 }
  0x9c   : > { %1574 = vpow2.f32 %v1453_v18 }
  0x9e   : > { %v469_v19 = vpop.f32.mrf.mxu2  ;;  %v378_v20 = vpop.f32.mrf.mxu0 }
  0x9f   : > { %v403_v21 = vpop.f32.mrf.mxu1  ;;  %v470_v40 = vadd.f32 %v1792_v32, %v469_v19 }
  0xa1   : > { %v1573_v22 = vpop.eup %1572 }
  0xa2   : > { %v1575_v23 = vpop.eup %1574  ;;  %v409_v24 = vadd.f32 1.0, %v1573_v22 }
  0xa3   : > { %v429_v25 = vadd.f32 1.0, %v1575_v23 }
  0xa4   : > { %1576 = vrcp.f32 %v409_v24  ;;  %v421_v34 = vand.u32 2147483648, %v409_v24  ;;  %v419_v36 = vand.u32 2147483647, %v409_v24  ;;  %vm415_vm3 = vweird.f32 %v409_v24 }
  0xa5   : > { %1578 = vrcp.f32 %v429_v25  ;;  %vm435_vm6 = vweird.f32 %v429_v25  ;;  %v441_v46 = vand.u32 2147483648, %v429_v25  ;;  %v439_v48 = vand.u32 2147483647, %v429_v25 }
  0xa6   : > { %v471_v26 = vpop.f32.mrf.mxu2  ;;  %v422_v41 = vor.u32 1.1754944e-38, %v421_v34  ;;  %vm420_vm5 = vcmp.eq.f32.partialorder %v419_v36, 8.507059e+37 }
  0xa7   : > { %v442_v51 = vor.u32 1.1754944e-38, %v441_v46  ;;  %vm440_vm9 = vcmp.eq.f32.partialorder %v439_v48, 8.507059e+37 }
  0xaa   : > { %v1577_v27 = vpop.eup %1576 }
  0xab   : > { %v1579_v28 = vpop.eup %1578  ;;  %v411_v29 = vmul.f32 %v1577_v27, %v409_v24  ;;  %vm416_vm2 = vweird.f32 %v1577_v27 }
  0xac   : > { %v431_v30 = vmul.f32 %v1579_v28, %v429_v25  ;;  %vm417_vm4 = vmor %vm415_vm3, %vm416_vm2  ;;  %vm436_vm7 = vweird.f32 %v1579_v28 }
  0xad   : > { %v412_v31 = vsub.f32 1.0, %v411_v29  ;;  %vm437_vm8 = vmor %vm435_vm6, %vm436_vm7 }
  0xae   : > { %v432_v33 = vsub.f32 1.0, %v431_v30 }
  0xaf   : > { %v413_v35 = vmul.f32 %v1577_v27, %v412_v31 }
  0xb0   : > { %v433_v37 = vmul.f32 %v1579_v28, %v432_v33 }
  0xb1   : > { %v414_v39 = vadd.f32 %v1577_v27, %v413_v35 }
  0xb2   : > { %v434_v45 = vadd.f32 %v1579_v28, %v433_v37 }
  0xb3   : > { %v418_v43 = vsel %vm417_vm4, %v1577_v27, %v414_v39 }
  0xb4   : > { %v423_v44 = vsel %vm420_vm5, %v422_v41, %v418_v43  ;;  %v438_v50 = vsel %vm437_vm8, %v1579_v28, %v434_v45  ;;  %v1467_v28 = vld [vmem:[%s1822_s14 + $0x5] sm:$0x1]  ;;  %s1511_s14 = smul.u32 4294967290, %s1667_s15 }
  0xb5   : > { %v473_v47 = vmul.f32 %v470_v40, %v423_v44  ;;  %v443_v52 = vsel %vm440_vm9, %v442_v51, %v438_v50  ;;  %v493_v33 = vunpack.c.l.bf16 %v1467_v28  ;;  %v1476_v51 = vld [vmem:[%s1848_s23 + $0x6] sm:$0x1] }
  0xb6   : > { %v476_v53 = vsub.f32 1.0, %v443_v52  ;;  %v478_v56 = vmul.f32 %v443_v52, %v1744_v6  ;;  %v1477_v52 = vld [vmem:[%s1848_s23 + $0x7] sm:$0x1]  ;;  %s1330_s20 = scalar_lea.vmem %s1801_s11, %s1511_s14 }
  0xb7   : > { %v474_v49 = vadd.f32 %v473_v47, %v349_v42 }
  0xb9   : > { %1580 = vtanh.f32 %v474_v49 }
  0xbf   : > { %v1581_v54 = vpop.eup %1580 }
  0xc0   : > { %v477_v55 = vmul.f32 %v1581_v54, %v476_v53  ;;  %v594_v54 = vunpack.c.l.bf16 %v1476_v51 }
  0xc2   : > { %v1805_v57 = vadd.f32 %v478_v56, %v477_v55  ;;  %v595_v55 = vunpack.c.l.bf16 %v1477_v52 }
  0xc4   : > { %483 = vst.msk [vmem:[%s481_s12] sm:$0x3] %vm323_vm0, %v1805_v57  ;;  %v494_v58 = vpack.c.bf16 %v1805_v57, %v1805_v57  ;;  %s1502_s12 = smul.u32 4294967287, %s1667_s15 }
  0xc6   : > { %1468 = vmatmul.msk.bf16.vlgmr.msra.gmra.mxu3 %vm363_vm1, %v494_v58  ;;  %1469 = vmatmul.msk.bf16.vlgmr.msrb.gmra.mxu0 %vm363_vm1, %v494_v58  ;;  %s1920_s13 = scalar_lea.vmem %s1784_s5, %s1502_s12 }
  0xc7   : > { %1472 = vmatmul.msk.bf16.vlgmr.msrb.gmra.mxu1 %vm363_vm1, %v494_v58  ;;  %775 = vmatpush.bf16.msra.mxu3 %v1736_v3 }
  0xc8   : > { %811 = vmatpush.bf16.msrb.mxu0 %v1732_v1  ;;  %824 = vmatpush.bf16.msrb.mxu1 %v1734_v2 }
  0xcb   : > { %776 = vmatpush.bf16.msra.mxu3 %v1747_v7 }
  0xcc   : > { %812 = vmatpush.bf16.msrb.mxu0 %v1740_v4  ;;  %825 = vmatpush.bf16.msrb.mxu1 %v1742_v5 }
 0x143   : > { %v520_v61 = vpop.f32.mrf.mxu0 }
 0x144   : > { %v544_v63 = vadd.f32 %v520_v61, %v492_v60  ;;  %v573_v0 = vpop.f32.mrf.mxu1 }
 0x145   : > { %v574_v34 = vadd.f32 %v1792_v32, %v573_v0 }
 0x146   : > { %v1471_v6 = vmul.f32 -1.442695, %v544_v63 }
 0x148   : > { %1582 = vpow2.f32 %v1471_v6 }
 0x149   : > { %v507_v9 = vpop.f32.mrf.mxu3 }
 0x14a   : > { %v524_v10 = vadd.f32 %v507_v9, %v491_v8 }
 0x14b   : > { %v522_v11 = vpop.f32.mrf.mxu0 }
 0x14c   : > { %v1470_v12 = vmul.f32 -1.442695, %v524_v10  ;;  %v575_v13 = vpop.f32.mrf.mxu1 }
 0x14e   : > { %v1583_v14 = vpop.eup %1582  ;;  %1584 = vpow2.f32 %v1470_v12 }
 0x14f   : > { %v548_v15 = vadd.f32 1.0, %v1583_v14 }
 0x151   : > { %v509_v16 = vpop.f32.mrf.mxu3  ;;  %1586 = vrcp.f32 %v548_v15  ;;  %v560_v38 = vand.u32 2147483648, %v548_v15  ;;  %vm554_vm15 = vweird.f32 %v548_v15  ;;  %v558_v40 = vand.u32 2147483647, %v548_v15 }
 0x153   : > { %v561_v43 = vor.u32 1.1754944e-38, %v560_v38  ;;  %vm559_vm3 = vcmp.eq.f32.partialorder %v558_v40, 8.507059e+37 }
 0x154   : > { %v1585_v17 = vpop.eup %1584 }
 0x155   : > { %v528_v18 = vadd.f32 1.0, %v1585_v17 }
 0x157   : > { %1588 = vrcp.f32 %v528_v18  ;;  %v1587_v19 = vpop.eup %1586  ;;  %v540_v25 = vand.u32 2147483648, %v528_v18  ;;  %v538_v27 = vand.u32 2147483647, %v528_v18  ;;  %vm534_vm11 = vweird.f32 %v528_v18 }
 0x158   : > { %v550_v20 = vmul.f32 %v1587_v19, %v548_v15  ;;  %vm555_vm14 = vweird.f32 %v1587_v19 }
 0x159   : > { %v541_v31 = vor.u32 1.1754944e-38, %v540_v25  ;;  %vm539_vm13 = vcmp.eq.f32.partialorder %v538_v27, 8.507059e+37  ;;  %vm556_vm2 = vmor %vm554_vm15, %vm555_vm14 }
 0x15a   : > { %v551_v23 = vsub.f32 1.0, %v550_v20  ;;  %v1478_v20 = vld [vmem:[%s1848_s23 + $0x8] sm:$0x1]  ;;  %s1522_s23 = smul.u32 4294967286, %s1667_s15 }
 0x15b   : > { %v596_v25 = vunpack.c.l.bf16 %v1478_v20 }
 0x15c   : > { %v552_v29 = vmul.f32 %v1587_v19, %v551_v23  ;;  %s1338_s24 = scalar_lea.vmem %s1801_s11, %s1522_s23 }
 0x15d   : > { %v1589_v21 = vpop.eup %1588 }
 0x15e   : > { %v530_v22 = vmul.f32 %v1589_v21, %v528_v18  ;;  %vm535_vm10 = vweird.f32 %v1589_v21  ;;  %v553_v36 = vadd.f32 %v1587_v19, %v552_v29 }
 0x15f   : > { %vm536_vm12 = vmor %vm534_vm11, %vm535_vm10 }
 0x160   : > { %v531_v24 = vsub.f32 1.0, %v530_v22  ;;  %v557_v42 = vsel %vm556_vm2, %v1587_v19, %v553_v36 }
 0x161   : > { %v562_v44 = vsel %vm559_vm3, %v561_v43, %v557_v42  ;;  %v1486_v43 = vld [vmem:[%s1315_s28 + $0x9] sm:$0x1] }
 0x162   : > { %v532_v26 = vmul.f32 %v1589_v21, %v531_v24  ;;  %v580_v45 = vsub.f32 1.0, %v562_v44  ;;  %v582_v48 = vmul.f32 %v562_v44, %v1805_v57  ;;  %v696_v44 = vunpack.c.l.bf16 %v1486_v43 }
 0x164   : > { %v533_v30 = vadd.f32 %v1589_v21, %v532_v26 }
 0x166   : > { %v537_v35 = vsel %vm536_vm12, %v1589_v21, %v533_v30 }
 0x167   : > { %v542_v37 = vsel %vm539_vm13, %v541_v31, %v537_v35 }
 0x168   : > { %v577_v39 = vmul.f32 %v574_v34, %v542_v37 }
 0x16a   : > { %v578_v41 = vadd.f32 %v577_v39, %v493_v33 }
 0x16c   : > { %1590 = vtanh.f32 %v578_v41 }
 0x172   : > { %v1591_v46 = vpop.eup %1590 }
 0x173   : > { %v581_v47 = vmul.f32 %v1591_v46, %v580_v45  ;;  %v1487_v46 = vld [vmem:[%s1315_s28 + $0xa] sm:$0x1] }
 0x175   : > { %v1831_v49 = vadd.f32 %v582_v48, %v581_v47 }
 0x177   : > { %1474 = vst.msk [vmem:[%s1304_s21 + $0x2] sm:$0x3] %vm323_vm0, %v1831_v49  ;;  %v597_v50 = vpack.c.bf16 %v1831_v49, %v1831_v49  ;;  %s1513_s21 = smul.u32 4294967281, %s1667_s15 }
 0x179   : > { %1479 = vmatmul.msk.bf16.vlgmr.msrb.gmra.mxu2 %vm363_vm1, %v597_v50  ;;  %1480 = vmatmul.msk.bf16.vlgmr.msrb.gmra.mxu3 %vm363_vm1, %v597_v50  ;;  %s1940_s22 = scalar_lea.vmem %s1784_s5, %s1513_s21 }
 0x17a   : > { %1483 = vmatmul.msk.bf16.vlgmr.msra.gmra.mxu0 %vm363_vm1, %v597_v50  ;;  %877 = vmatpush.bf16.msrb.mxu2 %v1736_v3 }
 0x17b   : > { %914 = vmatpush.bf16.msrb.mxu3 %v1732_v1  ;;  %927 = vmatpush.bf16.msra.mxu0 %v1734_v2 }
 0x17e   : > { %878 = vmatpush.bf16.msrb.mxu2 %v1747_v7 }
 0x17f   : > { %915 = vmatpush.bf16.msrb.mxu3 %v1740_v4  ;;  %928 = vmatpush.bf16.msra.mxu0 %v1742_v5 }
 0x1f7   : > { %v676_v53 = vpop.f32.mrf.mxu0 }
 0x1f8   : > { %v677_v24 = vadd.f32 %v1792_v32, %v676_v53 }
 0x1fc   : > { %v610_v56 = vpop.f32.mrf.mxu2  ;;  %v623_v57 = vpop.f32.mrf.mxu3 }
 0x1fd   : > { %v627_v58 = vadd.f32 %v610_v56, %v594_v54  ;;  %v647_v59 = vadd.f32 %v623_v57, %v595_v55 }
 0x1ff   : > { %v1481_v60 = vmul.f32 -1.442695, %v627_v58  ;;  %v1482_v61 = vmul.f32 -1.442695, %v647_v59  ;;  %v678_v62 = vpop.f32.mrf.mxu0 }
 0x201   : > { %1592 = vpow2.f32 %v1481_v60 }
 0x202   : > { %1594 = vpow2.f32 %v1482_v61 }
 0x204   : > { %v612_v63 = vpop.f32.mrf.mxu2  ;;  %v625_v0 = vpop.f32.mrf.mxu3 }
 0x207   : > { %v1593_v6 = vpop.eup %1592 }
 0x208   : > { %v1595_v8 = vpop.eup %1594  ;;  %v631_v9 = vadd.f32 1.0, %v1593_v6  ;;  %v1488_v6 = vld [vmem:[%s1315_s28 + $0xb] sm:$0x1] }
 0x209   : > { %v651_v10 = vadd.f32 1.0, %v1595_v8 }
 0x20a   : > { %1596 = vrcp.f32 %v631_v9  ;;  %v643_v16 = vand.u32 2147483648, %v631_v9  ;;  %v641_v19 = vand.u32 2147483647, %v631_v9  ;;  %vm637_vm5 = vweird.f32 %v631_v9 }
 0x20b   : > { %1598 = vrcp.f32 %v651_v10  ;;  %v663_v30 = vand.u32 2147483648, %v651_v10  ;;  %vm657_vm9 = vweird.f32 %v651_v10  ;;  %v661_v31 = vand.u32 2147483647, %v651_v10 }
 0x20c   : > { %v644_v23 = vor.u32 1.1754944e-38, %v643_v16  ;;  %vm642_vm7 = vcmp.eq.f32.partialorder %v641_v19, 8.507059e+37 }
 0x20d   : > { %v664_v35 = vor.u32 1.1754944e-38, %v663_v30  ;;  %vm662_vm11 = vcmp.eq.f32.partialorder %v661_v31, 8.507059e+37 }
 0x210   : > { %v1597_v11 = vpop.eup %1596 }
 0x211   : > { %v1599_v12 = vpop.eup %1598  ;;  %v633_v13 = vmul.f32 %v1597_v11, %v631_v9  ;;  %vm638_vm4 = vweird.f32 %v1597_v11 }
 0x212   : > { %v653_v14 = vmul.f32 %v1599_v12, %v651_v10  ;;  %vm639_vm6 = vmor %vm637_vm5, %vm638_vm4  ;;  %vm658_vm8 = vweird.f32 %v1599_v12 }
 0x213   : > { %v634_v15 = vsub.f32 1.0, %v633_v13  ;;  %vm659_vm10 = vmor %vm657_vm9, %vm658_vm8  ;;  %v698_v13 = vunpack.c.l.bf16 %v1488_v6 }
 0x214   : > { %v654_v17 = vsub.f32 1.0, %v653_v14 }
 0x215   : > { %v635_v18 = vmul.f32 %v1597_v11, %v634_v15 }
 0x216   : > { %v655_v21 = vmul.f32 %v1599_v12, %v654_v17 }
 0x217   : > { %v636_v22 = vadd.f32 %v1597_v11, %v635_v18 }
 0x218   : > { %v656_v28 = vadd.f32 %v1599_v12, %v655_v21 }
 0x219   : > { %v640_v26 = vsel %vm639_vm6, %v1597_v11, %v636_v22 }
 0x21a   : > { %v645_v27 = vsel %vm642_vm7, %v644_v23, %v640_v26  ;;  %v660_v34 = vsel %vm659_vm10, %v1599_v12, %v656_v28 }
 0x21b   : > { %v680_v29 = vmul.f32 %v677_v24, %v645_v27  ;;  %v665_v36 = vsel %vm662_vm11, %v664_v35, %v660_v34  ;;  %v795_v35 = vld [vmem:[%s1897_s8] sm:$0x1] }
 0x21c   : > { %v683_v37 = vsub.f32 1.0, %v665_v36  ;;  %v685_v40 = vmul.f32 %v665_v36, %v1831_v49  ;;  %v697_v49 = vunpack.c.l.bf16 %v1487_v46  ;;  %v796_v36 = vld [vmem:[%s1897_s8 + $0x1] sm:$0x1] }
 0x21d   : > { %v681_v33 = vadd.f32 %v680_v29, %v596_v25 }
 0x21f   : > { %1600 = vtanh.f32 %v681_v33 }
 0x225   : > { %v1601_v38 = vpop.eup %1600 }
 0x226   : > { %v684_v39 = vmul.f32 %v1601_v38, %v683_v37  ;;  %v798_v37 = vunpack.c.l.bf16 %v795_v35  ;;  %v799_v38 = vunpack.c.l.bf16 %v796_v36 }
 0x228   : > { %v1857_v41 = vadd.f32 %v685_v40, %v684_v39 }
 0x22a   : > { %1485 = vst.msk [vmem:[%s1312_s25 + $0x4] sm:$0x3] %vm323_vm0, %v1857_v41  ;;  %v699_v42 = vpack.c.bf16 %v1857_v41, %v1857_v41  ;;  %s1524_s25 = smul.u32 4294967275, %s1667_s15 }
 0x22c   : > { %1489 = vmatmul.msk.bf16.vlgmr.msra.gmra.mxu1 %vm363_vm1, %v699_v42  ;;  %1490 = vmatmul.msk.bf16.vlgmr.msra.gmra.mxu2 %vm363_vm1, %v699_v42  ;;  %s1342_s27 = scalar_lea.vmem %s1784_s5, %s1524_s25  ;;  %s1424_s5 = sshll.u32 %s1726_s19, 1 }
 0x22d   : > { %1493 = vmatmul.msk.bf16.vlgmr.msra.gmra.mxu3 %vm363_vm1, %v699_v42  ;;  %980 = vmatpush.bf16.msra.mxu1 %v1736_v3  ;;  %s317_s6 = scalar_lea.vmem %s1984_s4, %s1424_s5 }
 0x22e   : > { %1017 = vmatpush.bf16.msra.mxu2 %v1732_v1  ;;  %1030 = vmatpush.bf16.msra.mxu3 %v1734_v2 }
 0x231   : > { %981 = vmatpush.bf16.msra.mxu1 %v1747_v7 }
 0x232   : > { %1018 = vmatpush.bf16.msra.mxu2 %v1740_v4  ;;  %1031 = vmatpush.bf16.msra.mxu3 %v1742_v5 }
 0x2a9   : > { %v712_v45 = vpop.f32.mrf.mxu1 }
 0x2aa   : > { %v729_v47 = vadd.f32 %v712_v45, %v696_v44 }
 0x2ac   : > { %v1491_v48 = vmul.f32 -1.442695, %v729_v47 }
 0x2ae   : > { %1602 = vpow2.f32 %v1491_v48 }
 0x2af   : > { %v725_v50 = vpop.f32.mrf.mxu2 }
 0x2b0   : > { %v749_v51 = vadd.f32 %v725_v50, %v697_v49  ;;  %v778_v52 = vpop.f32.mrf.mxu3 }
 0x2b1   : > { %v714_v53 = vpop.f32.mrf.mxu1  ;;  %v779_v17 = vadd.f32 %v1792_v32, %v778_v52 }
 0x2b2   : > { %v1492_v54 = vmul.f32 -1.442695, %v749_v51 }
 0x2b4   : > { %v1603_v55 = vpop.eup %1602  ;;  %1604 = vpow2.f32 %v1492_v54 }
 0x2b5   : > { %v733_v56 = vadd.f32 1.0, %v1603_v55 }
 0x2b7   : > { %1606 = vrcp.f32 %v733_v56  ;;  %v727_v57 = vpop.f32.mrf.mxu2  ;;  %v745_v0 = vand.u32 2147483648, %v733_v56  ;;  %v743_v9 = vand.u32 2147483647, %v733_v56  ;;  %vm739_vm13 = vweird.f32 %v733_v56 }
 0x2b8   : > { %v780_v58 = vpop.f32.mrf.mxu3 }
 0x2b9   : > { %v746_v14 = vor.u32 1.1754944e-38, %v745_v0  ;;  %vm744_vm15 = vcmp.eq.f32.partialorder %v743_v9, 8.507059e+37 }
 0x2ba   : > { %v1605_v59 = vpop.eup %1604 }
 0x2bb   : > { %v753_v60 = vadd.f32 1.0, %v1605_v59  ;;  %v797_v59 = vld [vmem:[%s1897_s8 + $0x2] sm:$0x1] }
 0x2bd   : > { %v1607_v61 = vpop.eup %1606  ;;  %1608 = vrcp.f32 %v753_v60  ;;  %v765_v20 = vand.u32 2147483648, %v753_v60  ;;  %v763_v22 = vand.u32 2147483647, %v753_v60  ;;  %vm759_vm3 = vweird.f32 %v753_v60 }
 0x2be   : > { %v735_v62 = vmul.f32 %v1607_v61, %v733_v56  ;;  %vm740_vm12 = vweird.f32 %v1607_v61 }
 0x2bf   : > { %vm741_vm14 = vmor %vm739_vm13, %vm740_vm12  ;;  %v766_v25 = vor.u32 1.1754944e-38, %v765_v20  ;;  %vm764_vm5 = vcmp.eq.f32.partialorder %v763_v22, 8.507059e+37  ;;  %v1504_v22 = vld [vmem:[%s1920_s13 + $0x10] sm:$0x1] }
 0x2c0   : > { %v736_v63 = vsub.f32 1.0, %v735_v62  ;;  %v800_v62 = vunpack.c.l.bf16 %v797_v59 }
 0x2c2   : > { %v737_v8 = vmul.f32 %v1607_v61, %v736_v63 }
 0x2c3   : > { %v1609_v10 = vpop.eup %1608 }
 0x2c4   : > { %v755_v11 = vmul.f32 %v1609_v10, %v753_v60  ;;  %v738_v12 = vadd.f32 %v1607_v61, %v737_v8  ;;  %vm760_vm2 = vweird.f32 %v1609_v10 }
 0x2c5   : > { %vm761_vm4 = vmor %vm759_vm3, %vm760_vm2 }
 0x2c6   : > { %v756_v15 = vsub.f32 1.0, %v755_v11  ;;  %v742_v16 = vsel %vm741_vm14, %v1607_v61, %v738_v12 }
 0x2c7   : > { %v747_v18 = vsel %vm744_vm15, %v746_v14, %v742_v16 }
 0x2c8   : > { %v757_v19 = vmul.f32 %v1609_v10, %v756_v15  ;;  %v782_v21 = vmul.f32 %v779_v17, %v747_v18 }
 0x2ca   : > { %v758_v23 = vadd.f32 %v1609_v10, %v757_v19  ;;  %v783_v24 = vadd.f32 %v782_v21, %v698_v13 }
 0x2cc   : > { %v762_v26 = vsel %vm761_vm4, %v1609_v10, %v758_v23  ;;  %1610 = vtanh.f32 %v783_v24  ;;  %v902_v23 = vunpack.c.l.bf16 %v1504_v22 }
 0x2cd   : > { %v767_v27 = vsel %vm764_vm5, %v766_v25, %v762_v26  ;;  %v1503_v25 = vld [vmem:[%s1920_s13 + $0xf] sm:$0x1] }
 0x2ce   : > { %v785_v28 = vsub.f32 1.0, %v767_v27  ;;  %v787_v31 = vmul.f32 %v767_v27, %v1857_v41 }
 0x2d2   : > { %v1611_v29 = vpop.eup %1610 }
 0x2d3   : > { %v786_v30 = vmul.f32 %v1611_v29, %v785_v28  ;;  %v901_v29 = vunpack.c.l.bf16 %v1503_v25 }
 0x2d5   : > { %v1878_v33 = vadd.f32 %v787_v31, %v786_v30 }
 0x2d7   : > { %1495 = vst.msk [vmem:[%s1318_s30 + $0x6] sm:$0x3] %vm323_vm0, %v1878_v33  ;;  %v801_v34 = vpack.c.bf16 %v1878_v33, %v1878_v33 }
 0x2d9   : > { %1496 = vmatmul.msk.bf16.vlgmr.msrb.gmra.mxu0 %vm363_vm1, %v801_v34  ;;  %1497 = vmatmul.msk.bf16.vlgmr.msrb.gmra.mxu1 %vm363_vm1, %v801_v34 }
 0x2da   : > { %1500 = vmatmul.msk.bf16.vlgmr.msrb.gmra.mxu2 %vm363_vm1, %v801_v34  ;;  %1083 = vmatpush.bf16.msrb.mxu0 %v1736_v3 }
 0x2db   : > { %1120 = vmatpush.bf16.msrb.mxu1 %v1732_v1  ;;  %1133 = vmatpush.bf16.msrb.mxu2 %v1734_v2 }
 0x2de   : > { %1084 = vmatpush.bf16.msrb.mxu0 %v1747_v7 }
 0x2df   : > { %1121 = vmatpush.bf16.msrb.mxu1 %v1740_v4  ;;  %1134 = vmatpush.bf16.msrb.mxu2 %v1742_v5 }
 0x356   : > { %v814_v1 = vpop.f32.mrf.mxu0  ;;  %v827_v39 = vpop.f32.mrf.mxu1 }
 0x357   : > { %v831_v2 = vadd.f32 %v814_v1, %v798_v37  ;;  %v851_v40 = vadd.f32 %v827_v39, %v799_v38 }
 0x359   : > { %v1498_v41 = vmul.f32 -1.442695, %v831_v2  ;;  %v1499_v42 = vmul.f32 -1.442695, %v851_v40 }
 0x35b   : > { %1612 = vpow2.f32 %v1498_v41 }
 0x35c   : > { %1614 = vpow2.f32 %v1499_v42 }
 0x35d   : > { %v880_v4 = vpop.f32.mrf.mxu2 }
 0x35e   : > { %v816_v5 = vpop.f32.mrf.mxu0  ;;  %v829_v43 = vpop.f32.mrf.mxu1  ;;  %v881_v0 = vadd.f32 %v1792_v32, %v880_v4 }
 0x361   : > { %v1613_v44 = vpop.eup %1612 }
 0x362   : > { %v1615_v45 = vpop.eup %1614  ;;  %v835_v46 = vadd.f32 1.0, %v1613_v44  ;;  %v1505_v44 = vld [vmem:[%s1920_s13 + $0x11] sm:$0x1] }
 0x363   : > { %v855_v47 = vadd.f32 1.0, %v1615_v45 }
 0x364   : > { %1616 = vrcp.f32 %v835_v46  ;;  %v847_v55 = vand.u32 2147483648, %v835_v46  ;;  %v845_v57 = vand.u32 2147483647, %v835_v46  ;;  %vm841_vm7 = vweird.f32 %v835_v46 }
 0x365   : > { %1618 = vrcp.f32 %v855_v47  ;;  %v882_v48 = vpop.f32.mrf.mxu2  ;;  %v867_v9 = vand.u32 2147483648, %v855_v47  ;;  %vm861_vm11 = vweird.f32 %v855_v47  ;;  %v865_v11 = vand.u32 2147483647, %v855_v47 }
 0x366   : > { %v848_v61 = vor.u32 1.1754944e-38, %v847_v55  ;;  %vm846_vm9 = vcmp.eq.f32.partialorder %v845_v57, 8.507059e+37  ;;  %v903_v48 = vunpack.c.l.bf16 %v1505_v44 }
 0x367   : > { %v868_v14 = vor.u32 1.1754944e-38, %v867_v9  ;;  %vm866_vm13 = vcmp.eq.f32.partialorder %v865_v11, 8.507059e+37  ;;  %v1515_v9 = vld [vmem:[%s1940_s22 + $0x13] sm:$0x1] }
 0x36a   : > { %v1617_v49 = vpop.eup %1616 }
 0x36b   : > { %v1619_v50 = vpop.eup %1618  ;;  %v837_v51 = vmul.f32 %v1617_v49, %v835_v46  ;;  %vm842_vm6 = vweird.f32 %v1617_v49 }
 0x36c   : > { %v857_v52 = vmul.f32 %v1619_v50, %v855_v47  ;;  %vm843_vm8 = vmor %vm841_vm7, %vm842_vm6  ;;  %vm862_vm10 = vweird.f32 %v1619_v50 }
 0x36d   : > { %v838_v53 = vsub.f32 1.0, %v837_v51  ;;  %vm863_vm12 = vmor %vm861_vm11, %vm862_vm10 }
 0x36e   : > { %v858_v54 = vsub.f32 1.0, %v857_v52 }
 0x36f   : > { %v839_v56 = vmul.f32 %v1617_v49, %v838_v53 }
 0x370   : > { %v859_v58 = vmul.f32 %v1619_v50, %v858_v54 }
 0x371   : > { %v840_v60 = vadd.f32 %v1617_v49, %v839_v56 }
 0x372   : > { %v860_v6 = vadd.f32 %v1619_v50, %v859_v58 }
 0x373   : > { %v844_v63 = vsel %vm843_vm8, %v1617_v49, %v840_v60 }
 0x374   : > { %v849_v8 = vsel %vm846_vm9, %v848_v61, %v844_v63  ;;  %v864_v13 = vsel %vm863_vm12, %v1619_v50, %v860_v6 }
 0x375   : > { %v884_v10 = vmul.f32 %v881_v0, %v849_v8  ;;  %v869_v15 = vsel %vm866_vm13, %v868_v14, %v864_v13  ;;  %v1514_v8 = vld [vmem:[%s1940_s22 + $0x12] sm:$0x1] }
 0x376   : > { %v887_v16 = vsub.f32 1.0, %v869_v15  ;;  %v889_v19 = vmul.f32 %v869_v15, %v1878_v33  ;;  %v1004_v11 = vunpack.c.l.bf16 %v1514_v8 }
 0x377   : > { %v885_v12 = vadd.f32 %v884_v10, %v800_v62 }
 0x379   : > { %1620 = vtanh.f32 %v885_v12  ;;  %v1005_v12 = vunpack.c.l.bf16 %v1515_v9 }
 0x37f   : > { %v1621_v17 = vpop.eup %1620 }
 0x380   : > { %v888_v18 = vmul.f32 %v1621_v17, %v887_v16 }
 0x382   : > { %v1907_v20 = vadd.f32 %v889_v19, %v888_v18 }
 0x384   : > { %893 = vst.msk [vmem:[%s892_s10] sm:$0x3] %vm323_vm0, %v1907_v20  ;;  %v904_v21 = vpack.c.bf16 %v1907_v20, %v1907_v20 }
 0x386   : > { %1506 = vmatmul.msk.bf16.vlgmr.msrb.gmra.mxu3 %vm363_vm1, %v904_v21  ;;  %1507 = vmatmul.msk.bf16.vlgmr.msra.gmra.mxu0 %vm363_vm1, %v904_v21 }
 0x387   : > { %1510 = vmatmul.msk.bf16.vlgmr.msra.gmra.mxu1 %vm363_vm1, %v904_v21  ;;  %1186 = vmatpush.bf16.msrb.mxu3 %v1736_v3 }
 0x38b   : > { %1187 = vmatpush.bf16.msrb.mxu3 %v1747_v7 }
 0x403   : > { %v930_v24 = vpop.f32.mrf.mxu0 }
 0x404   : > { %v954_v26 = vadd.f32 %v930_v24, %v902_v23  ;;  %v983_v27 = vpop.f32.mrf.mxu1 }
 0x405   : > { %v984_v49 = vadd.f32 %v1792_v32, %v983_v27 }
 0x406   : > { %v1509_v28 = vmul.f32 -1.442695, %v954_v26 }
 0x408   : > { %1622 = vpow2.f32 %v1509_v28 }
 0x409   : > { %v917_v30 = vpop.f32.mrf.mxu3 }
 0x40a   : > { %v934_v31 = vadd.f32 %v917_v30, %v901_v29 }
 0x40b   : > { %v932_v33 = vpop.f32.mrf.mxu0 }
 0x40c   : > { %v1508_v3 = vmul.f32 -1.442695, %v934_v31  ;;  %v985_v34 = vpop.f32.mrf.mxu1 }
 0x40e   : > { %v1623_v7 = vpop.eup %1622  ;;  %1624 = vpow2.f32 %v1508_v3 }
 0x40f   : > { %v958_v35 = vadd.f32 1.0, %v1623_v7  ;;  %v1516_v7 = vld [vmem:[%s1940_s22 + $0x14] sm:$0x1] }
 0x411   : > { %v919_v36 = vpop.f32.mrf.mxu3  ;;  %1626 = vrcp.f32 %v958_v35  ;;  %v970_v53 = vand.u32 2147483648, %v958_v35  ;;  %vm964_vm5 = vweird.f32 %v958_v35  ;;  %v968_v55 = vand.u32 2147483647, %v958_v35 }
 0x413   : > { %v971_v58 = vor.u32 1.1754944e-38, %v970_v53  ;;  %vm969_vm7 = vcmp.eq.f32.partialorder %v968_v55, 8.507059e+37 }
 0x414   : > { %v1625_v37 = vpop.eup %1624 }
 0x415   : > { %v938_v38 = vadd.f32 1.0, %v1625_v37 }
 0x417   : > { %1628 = vrcp.f32 %v938_v38  ;;  %v1627_v1 = vpop.eup %1626  ;;  %v950_v4 = vand.u32 2147483648, %v938_v38  ;;  %v948_v43 = vand.u32 2147483647, %v938_v38  ;;  %vm944_vm15 = vweird.f32 %v938_v38 }
 0x418   : > { %v960_v39 = vmul.f32 %v1627_v1, %v958_v35  ;;  %vm965_vm4 = vweird.f32 %v1627_v1 }
 0x419   : > { %v951_v47 = vor.u32 1.1754944e-38, %v950_v4  ;;  %vm949_vm3 = vcmp.eq.f32.partialorder %v948_v43, 8.507059e+37  ;;  %vm966_vm6 = vmor %vm964_vm5, %vm965_vm4 }
 0x41a   : > { %v961_v41 = vsub.f32 1.0, %v960_v39 }
 0x41c   : > { %v962_v45 = vmul.f32 %v1627_v1, %v961_v41 }
 0x41d   : > { %v1629_v2 = vpop.eup %1628 }
 0x41e   : > { %v940_v40 = vmul.f32 %v1629_v2, %v938_v38  ;;  %vm945_vm14 = vweird.f32 %v1629_v2  ;;  %v963_v51 = vadd.f32 %v1627_v1, %v962_v45 }
 0x41f   : > { %vm946_vm2 = vmor %vm944_vm15, %vm945_vm14 }
 0x420   : > { %v941_v42 = vsub.f32 1.0, %v940_v40  ;;  %v967_v57 = vsel %vm966_vm6, %v1627_v1, %v963_v51  ;;  %v1006_v1 = vunpack.c.l.bf16 %v1516_v7  ;;  %v1525_v51 = vld [vmem:[%s1342_s27 + $0x15] sm:$0x1] }
 0x421   : > { %v972_v59 = vsel %vm969_vm7, %v971_v58, %v967_v57 }
 0x422   : > { %v942_v5 = vmul.f32 %v1629_v2, %v941_v42  ;;  %v990_v60 = vsub.f32 1.0, %v972_v59  ;;  %v992_v63 = vmul.f32 %v972_v59, %v1907_v20 }
 0x424   : > { %v943_v46 = vadd.f32 %v1629_v2, %v942_v5 }
 0x426   : > { %v947_v50 = vsel %vm946_vm2, %v1629_v2, %v943_v46 }
 0x427   : > { %v952_v52 = vsel %vm949_vm3, %v951_v47, %v947_v50 }
 0x428   : > { %v987_v54 = vmul.f32 %v984_v49, %v952_v52  ;;  %v1107_v52 = vunpack.c.l.bf16 %v1525_v51 }
 0x42a   : > { %v988_v56 = vadd.f32 %v987_v54, %v903_v48  ;;  %v1526_v54 = vld [vmem:[%s1342_s27 + $0x16] sm:$0x1] }
 0x42b   : > { %v1108_v57 = vunpack.c.l.bf16 %v1526_v54 }
 0x42c   : > { %1630 = vtanh.f32 %v988_v56 }
 0x432   : > { %v1631_v61 = vpop.eup %1630 }
 0x433   : > { %v991_v62 = vmul.f32 %v1631_v61, %v990_v60 }
 0x435   : > { %v1929_v0 = vadd.f32 %v992_v63, %v991_v62 }
 0x437   : > { %1512 = vst.msk [vmem:[%s1330_s20 + $0xa] sm:$0x3] %vm323_vm0, %v1929_v0  ;;  %v1007_v6 = vpack.c.bf16 %v1929_v0, %v1929_v0 }
 0x439   : > { %1517 = vmatmul.msk.bf16.vlgmr.msra.gmra.mxu2 %vm363_vm1, %v1007_v6  ;;  %1518 = vmatmul.msk.bf16.vlgmr.msra.gmra.mxu3 %vm363_vm1, %v1007_v6 }
 0x43a   : > { %1521 = vmatmul.msk.bf16.vlgmr.msrb.gmra.mxu0 %vm363_vm1, %v1007_v6 }
 0x4b7   : > { %v1086_v10 = vpop.f32.mrf.mxu0 }
 0x4b8   : > { %v1087_v38 = vadd.f32 %v1792_v32, %v1086_v10 }
 0x4bc   : > { %v1020_v13 = vpop.f32.mrf.mxu2  ;;  %v1033_v14 = vpop.f32.mrf.mxu3 }
 0x4bd   : > { %v1037_v15 = vadd.f32 %v1020_v13, %v1004_v11  ;;  %v1057_v16 = vadd.f32 %v1033_v14, %v1005_v12 }
 0x4bf   : > { %v1519_v17 = vmul.f32 -1.442695, %v1037_v15  ;;  %v1520_v18 = vmul.f32 -1.442695, %v1057_v16  ;;  %v1088_v19 = vpop.f32.mrf.mxu0  ;;  %v1527_v15 = vld [vmem:[%s1342_s27 + $0x17] sm:$0x1] }
 0x4c1   : > { %1632 = vpow2.f32 %v1519_v17 }
 0x4c2   : > { %1634 = vpow2.f32 %v1520_v18 }
 0x4c4   : > { %v1022_v20 = vpop.f32.mrf.mxu2  ;;  %v1035_v21 = vpop.f32.mrf.mxu3 }
 0x4c5   : > { %v1109_v21 = vunpack.c.l.bf16 %v1527_v15 }
 0x4c7   : > { %v1633_v22 = vpop.eup %1632 }
 0x4c8   : > { %v1635_v23 = vpop.eup %1634  ;;  %v1041_v24 = vadd.f32 1.0, %v1633_v22 }
 0x4c9   : > { %v1061_v25 = vadd.f32 1.0, %v1635_v23 }
 0x4ca   : > { %1636 = vrcp.f32 %v1041_v24  ;;  %v1053_v31 = vand.u32 2147483648, %v1041_v24  ;;  %v1051_v34 = vand.u32 2147483647, %v1041_v24  ;;  %vm1047_vm9 = vweird.f32 %v1041_v24 }
 0x4cb   : > { %1638 = vrcp.f32 %v1061_v25  ;;  %v1073_v42 = vand.u32 2147483648, %v1061_v25  ;;  %vm1067_vm13 = vweird.f32 %v1061_v25  ;;  %v1071_v4 = vand.u32 2147483647, %v1061_v25 }
 0x4cc   : > { %v1054_v37 = vor.u32 1.1754944e-38, %v1053_v31  ;;  %vm1052_vm11 = vcmp.eq.f32.partialorder %v1051_v34, 8.507059e+37 }
 0x4cd   : > { %v1074_v44 = vor.u32 1.1754944e-38, %v1073_v42  ;;  %vm1072_vm15 = vcmp.eq.f32.partialorder %v1071_v4, 8.507059e+37 }
 0x4d0   : > { %v1637_v26 = vpop.eup %1636 }
 0x4d1   : > { %v1639_v27 = vpop.eup %1638  ;;  %v1043_v28 = vmul.f32 %v1637_v26, %v1041_v24  ;;  %vm1048_vm8 = vweird.f32 %v1637_v26 }
 0x4d2   : > { %v1063_v29 = vmul.f32 %v1639_v27, %v1061_v25  ;;  %vm1049_vm10 = vmor %vm1047_vm9, %vm1048_vm8  ;;  %vm1068_vm12 = vweird.f32 %v1639_v27  ;;  %v1652_v25 = vld [vmem:[%s1777_s26] ss:$0 sm:$0xff]  ;;  %s1533_s26 = smul.u32 4294967282, %s1667_s15 }
 0x4d3   : > { %v1044_v30 = vsub.f32 1.0, %v1043_v28  ;;  %vm1069_vm14 = vmor %vm1067_vm13, %vm1068_vm12 }
 0x4d4   : > { %v1064_v33 = vsub.f32 1.0, %v1063_v29  ;;  %s1346_s28 = scalar_lea.vmem %s1801_s11, %s1533_s26 }
 0x4d5   : > { %v1045_v3 = vmul.f32 %v1637_v26, %v1044_v30 }
 0x4d6   : > { %v1065_v35 = vmul.f32 %v1639_v27, %v1064_v33 }
 0x4d7   : > { %v1046_v36 = vadd.f32 %v1637_v26, %v1045_v3 }
 0x4d8   : > { %v1066_v40 = vadd.f32 %v1639_v27, %v1065_v35 }
 0x4d9   : > { %v1050_v39 = vsel %vm1049_vm10, %v1637_v26, %v1046_v36 }
 0x4da   : > { %v1055_v2 = vsel %vm1052_vm11, %v1054_v37, %v1050_v39  ;;  %v1070_v43 = vsel %vm1069_vm14, %v1639_v27, %v1066_v40 }
 0x4db   : > { %v1090_v41 = vmul.f32 %v1087_v38, %v1055_v2  ;;  %v1075_v32 = vsel %vm1072_vm15, %v1074_v44, %v1070_v43 }
 0x4dc   : > { %v1093_v45 = vsub.f32 1.0, %v1075_v32  ;;  %v1095_v48 = vmul.f32 %v1075_v32, %v1929_v0 }
 0x4dd   : > { %v1091_v5 = vadd.f32 %v1090_v41, %v1006_v1 }
 0x4df   : > { %1640 = vtanh.f32 %v1091_v5 }
 0x4e5   : > { %v1641_v46 = vpop.eup %1640 }
 0x4e6   : > { %v1094_v47 = vmul.f32 %v1641_v46, %v1093_v45 }
 0x4e8   : > { %v1949_v49 = vadd.f32 %v1095_v48, %v1094_v47 }
 0x4ea   : > { %1523 = vst.msk [vmem:[%s1338_s24 + $0xc] sm:$0x3] %vm323_vm0, %v1949_v49  ;;  %v1110_v50 = vpack.c.bf16 %v1949_v49, %v1949_v49 }
 0x4ec   : > { %1528 = vmatmul.msk.bf16.vlgmr.msrb.gmra.mxu1 %vm363_vm1, %v1110_v50  ;;  %1529 = vmatmul.msk.bf16.vlgmr.msrb.gmra.mxu2 %vm363_vm1, %v1110_v50 }
 0x4ed   : > { %1532 = vmatmul.msk.bf16.vlgmr.msrb.gmra.mxu3 %vm363_vm1, %v1110_v50 }
 0x569   : > { %v1123_v53 = vpop.f32.mrf.mxu1 }
 0x56a   : > { %v1140_v55 = vadd.f32 %v1123_v53, %v1107_v52 }
 0x56c   : > { %v1530_v56 = vmul.f32 -1.442695, %v1140_v55 }
 0x56e   : > { %1642 = vpow2.f32 %v1530_v56 }
 0x56f   : > { %v1136_v58 = vpop.f32.mrf.mxu2 }
 0x570   : > { %v1160_v59 = vadd.f32 %v1136_v58, %v1108_v57  ;;  %v1189_v60 = vpop.f32.mrf.mxu3 }
 0x571   : > { %v1125_v61 = vpop.f32.mrf.mxu1  ;;  %v1190_v26 = vadd.f32 %v1652_v25, %v1189_v60 }
 0x572   : > { %v1531_v62 = vmul.f32 -1.442695, %v1160_v59 }
 0x574   : > { %v1643_v63 = vpop.eup %1642  ;;  %1644 = vpow2.f32 %v1531_v62 }
 0x575   : > { %v1144_v0 = vadd.f32 1.0, %v1643_v63 }
 0x577   : > { %1646 = vrcp.f32 %v1144_v0  ;;  %v1138_v6 = vpop.f32.mrf.mxu2  ;;  %v1156_v14 = vand.u32 2147483648, %v1144_v0  ;;  %v1154_v17 = vand.u32 2147483647, %v1144_v0  ;;  %vm1150_vm2 = vweird.f32 %v1144_v0 }
 0x578   : > { %v1191_v8 = vpop.f32.mrf.mxu3 }
 0x579   : > { %v1157_v22 = vor.u32 1.1754944e-38, %v1156_v14  ;;  %vm1155_vm4 = vcmp.eq.f32.partialorder %v1154_v17, 8.507059e+37 }
 0x57a   : > { %v1645_v9 = vpop.eup %1644 }
 0x57b   : > { %v1164_v10 = vadd.f32 1.0, %v1645_v9 }
 0x57d   : > { %v1647_v11 = vpop.eup %1646  ;;  %1648 = vrcp.f32 %v1164_v10  ;;  %v1176_v29 = vand.u32 2147483648, %v1164_v10  ;;  %v1174_v31 = vand.u32 2147483647, %v1164_v10  ;;  %vm1170_vm6 = vweird.f32 %v1164_v10 }
 0x57e   : > { %v1146_v12 = vmul.f32 %v1647_v11, %v1144_v0  ;;  %vm1151_vm1 = vweird.f32 %v1647_v11 }
 0x57f   : > { %vm1152_vm3 = vmor %vm1150_vm2, %vm1151_vm1  ;;  %v1177_v34 = vor.u32 1.1754944e-38, %v1176_v29  ;;  %vm1175_vm8 = vcmp.eq.f32.partialorder %v1174_v31, 8.507059e+37 }
 0x580   : > { %v1147_v13 = vsub.f32 1.0, %v1146_v12 }
 0x582   : > { %v1148_v16 = vmul.f32 %v1647_v11, %v1147_v13 }
 0x583   : > { %v1649_v18 = vpop.eup %1648 }
 0x584   : > { %v1166_v19 = vmul.f32 %v1649_v18, %v1164_v10  ;;  %v1149_v20 = vadd.f32 %v1647_v11, %v1148_v16  ;;  %vm1171_vm5 = vweird.f32 %v1649_v18 }
 0x585   : > { %vm1172_vm7 = vmor %vm1170_vm6, %vm1171_vm5 }
 0x586   : > { %v1167_v23 = vsub.f32 1.0, %v1166_v19  ;;  %v1153_v24 = vsel %vm1152_vm3, %v1647_v11, %v1149_v20 }
 0x587   : > { %v1158_v27 = vsel %vm1155_vm4, %v1157_v22, %v1153_v24 }
 0x588   : > { %v1168_v28 = vmul.f32 %v1649_v18, %v1167_v23  ;;  %v1193_v30 = vmul.f32 %v1190_v26, %v1158_v27 }
 0x58a   : > { %v1169_v33 = vadd.f32 %v1649_v18, %v1168_v28  ;;  %v1194_v3 = vadd.f32 %v1193_v30, %v1109_v21 }
 0x58c   : > { %v1173_v7 = vsel %vm1172_vm7, %v1649_v18, %v1169_v33  ;;  %1650 = vtanh.f32 %v1194_v3 }
 0x58d   : > { %v1178_v35 = vsel %vm1175_vm8, %v1177_v34, %v1173_v7 }
 0x58e   : > { %v1196_v36 = vsub.f32 1.0, %v1178_v35  ;;  %v1198_v1 = vmul.f32 %v1178_v35, %v1949_v49 }
 0x592   : > { %v1651_v37 = vpop.eup %1650 }
 0x593   : > { %v1197_v38 = vmul.f32 %v1651_v37, %v1196_v36 }
 0x595   : > { %v1199_v39 = vadd.f32 %v1198_v1, %v1197_v38 }
 0x597   : > { %1534 = vst.msk [vmem:[%s1346_s28 + $0xe] sm:$0x3] %vm323_vm0, %v1199_v39 }
 0x598   : > { %1203 = vst.msk [vmem:[#allocation2] sm:$0x3] %vm323_vm0, %v1199_v39 }
 0x599   : > { %1207 = vst.msk [vmem:[%s317_s6] sm:$0x3] %vm323_vm0, %v1199_v39 }
 0x59a PF: > { %s15_s17 = sadd.s32 1, %s1675_s17   ;;  %s1985_s15 = smov %s1671_s16 }
 0x59b   : > { %p12_p5 = scmp.ge.s32.totalorder %s15_s17, 4   ;;  %s1986_s16 = smov %s1988_s18 }
 0x59d   :  { %14 = sbr.rel (!%p12_p5) target bundleno = 2 (0x2), region = 106 }

</bundles_post_ra>
